<compile_context>
chip_gen: v6e
topology: v6e:2x2x1
jax: 0.10.0
libtpu: 0.0.40
codegen_flags: <defaults>
</compile_context>

<pallas_src>
import jax
import jax.numpy as jnp
from jax import lax
from jax.experimental import pallas as pl
from jax.experimental.pallas import tpu as pltpu

# ---------------- small synthetic config ----------------
BATCH = 2
SEQ = 8
HIDDEN = 32          # stand-in for roberta hidden_size (768 in roberta-base)
NUM_HEADS = 4
HEAD_DIM = HIDDEN // NUM_HEADS
FF_DIM = 64
VOCAB = 50
VOCAB_PAD = 128      # one-hot lane width for the in-kernel embedding gather
NUM_FEATS = 16       # num_numerical_features
NUM_LABELS = 5
CONV_C = 32          # out_channels of each Conv1d branch
NUM_TAPS = 8         # 7 conv taps (d = -3..3) padded to 8
OUT_PAD = 128        # lane-dense logits width (sliced to NUM_LABELS in the wrapper)

# ---- packed-slab layout constants ----
# w_h slab [HIDDEN, 768] bf16 : every sub-weight starts at a 128-aligned lane offset
QO, KO, VO, OO, F1O, PO = 0, 128, 256, 384, 512, 640
W_H_COLS = 768

# w_big slab [608, 128] bf16 : 128-lane weights, sublane-stacked (offsets are multiples of 8)
R_NUM1 = 0      # Linear(96,128)  padded to [128,128] (rows 96: zero)
R_NUM2 = 128    # Linear(128,64)  padded to [128,128] (cols 64: zero)
R_CLS1P = 256   # classifier Wc1 rows acting on pooled   [32,128]
R_CLS1N = 288   # classifier Wc1 rows acting on num_out  padded to [128,128] (rows 64: zero)
R_CLS2 = 416    # Linear(128, num_labels) padded to [128,128] (cols >= NUM_LABELS zero)
R_FF2 = 544     # encoder FF2 [64,32] stored in cols 0:32
W_BIG_ROWS = 608

# misc slab [24, 128] f32 : LayerNorm params + every bias, one per row
M_LNE_G, M_LNE_B, M_LN1_G, M_LN1_B, M_LN2_G, M_LN2_B = 0, 1, 2, 3, 4, 5
M_BQ, M_BK, M_BV, M_BO, M_BFF1, M_BFF2, M_BPOOL = 6, 7, 8, 9, 10, 11, 12
M_BCONV, M_BNUM1, M_BNUM2, M_BCLS1, M_BCLS2 = 13, 14, 15, 16, 17
MISC_ROWS = 24


# ---------------- fused Pallas kernel ----------------

def multimodal_kernel(
    ids_ref,      # [B*S, 1] int32  token ids
    mask_ref,     # [B, S]   int32  attention mask (1 keep / 0 pad)
    num_ref,      # [B, F]   f32    numerical features
    emb_ref,      # [136, H] bf16   rows 0:128 tok_emb (ids < VOCAB valid), rows 128:136 pos_emb
    w_h_ref,      # [H, 768] bf16   Wq(scaled)@0 | Wk@128 | Wv@256 | Wo@384 | Wff1@512 | Wpool@640
    w_convT_ref,  # [F, F*128] bf16 Toeplitz conv weight: all 3 Conv1d branches in one matmul
    w_big_ref,    # [608, 128] bf16 num_fc / classifier / ff2 weights, sublane-stacked
    misc_ref,     # [24, 128] f32   LN params + biases (one per row)
    out_ref,      # [B, 128] f32    lane-dense logits (cols >= NUM_LABELS zero)
):
    B, S = mask_ref.shape
    H = HIDDEN
    f32 = jnp.float32
    bf16 = jnp.bfloat16

    def mrow(i, width=128):            # read one bias/param row straight from the ref
        return misc_ref[i:i + 1, 0:width]          # [1, width] f32

    def layer_norm(h, gi, bi):
        g, b = mrow(gi, H), mrow(bi, H)
        mu = jnp.mean(h, axis=-1, keepdims=True)
        var = jnp.mean((h - mu) ** 2, axis=-1, keepdims=True)
        return (h - mu) * lax.rsqrt(var + 1e-5) * g + b

    # ---- embedding gather fused in-kernel as a one-hot MXU matmul (no x HBM round trip) ----
    ids = ids_ref[...]                                             # [B*S, 1] int32
    onehot = jnp.where(
        lax.broadcasted_iota(jnp.int32, (B * S, VOCAB_PAD), 1) == ids, 1.0, 0.0
    ).astype(bf16)                                                 # [B*S, 128]
    tok = jnp.dot(onehot, emb_ref[0:VOCAB_PAD, :], preferred_element_type=f32)   # [B*S, H]
    pos = emb_ref[VOCAB_PAD:VOCAB_PAD + S, :].astype(f32)          # [S, H]
    x = tok.reshape(B, S, H) + pos[None, :, :]
    x = layer_norm(x, M_LNE_G, M_LNE_B)

    # ---- synthetic RoBERTa layer: self-attention (1/sqrt(d) folded into Wq/bq at pack time) ----
    x2 = x.reshape(B * S, H).astype(bf16)
    q = jnp.dot(x2, w_h_ref[:, QO:QO + H], preferred_element_type=f32) + mrow(M_BQ, H)
    k = jnp.dot(x2, w_h_ref[:, KO:KO + H], preferred_element_type=f32) + mrow(M_BK, H)
    v = jnp.dot(x2, w_h_ref[:, VO:VO + H], preferred_element_type=f32) + mrow(M_BV, H)
    q = q.reshape(B, S, H)
    k = k.reshape(B, S, H)
    v = v.reshape(B, S, H)

    # additive key mask (0 keep / -1e9 pad), hoisted once out of the head loop.
    # NOTE: an all-zero mask row would give a uniform softmax over padded keys (no NaN guard) --
    # cannot occur with the inputs used here.
    key_bias = ((mask_ref[...].astype(f32) - 1.0) * 1e9)[:, None, :]           # [B, 1, S]

    # TODO(synk): per-head Python loop kept (NUM_HEADS=4): collapsing it into one batched einsum needs
    # a minor-dim-splitting reshape/4D transpose that is riskier to lower than 4 tiny per-head matmuls,
    # which sit far under the MXU slack at these shapes.
    ctx_heads = []
    for h in range(NUM_HEADS):
        lo = h * HEAD_DIM
        qh = q[:, :, lo:lo + HEAD_DIM]                             # [B, S, hd]
        kh = k[:, :, lo:lo + HEAD_DIM]
        vh = v[:, :, lo:lo + HEAD_DIM]
        s = jnp.einsum('bqd,bkd->bqk', qh, kh, preferred_element_type=f32)      # [B, S, S]
        s = s + key_bias
        s = s - jnp.max(s, axis=-1, keepdims=True)
        e = jnp.exp(s)
        p = e * pl.reciprocal(jnp.sum(e, axis=-1, keepdims=True), approx=True)
        ctx_heads.append(jnp.einsum('bqk,bkd->bqd', p, vh, preferred_element_type=f32))
    ctx = jnp.concatenate(ctx_heads, axis=-1).reshape(B * S, H).astype(bf16)    # single O-proj matmul
    attn = jnp.dot(ctx, w_h_ref[:, OO:OO + H], preferred_element_type=f32) + mrow(M_BO, H)
    x = layer_norm(x + attn.reshape(B, S, H), M_LN1_G, M_LN1_B)

    # ---- FFN ----
    ff = jnp.dot(x.reshape(B * S, H).astype(bf16), w_h_ref[:, F1O:F1O + FF_DIM],
                 preferred_element_type=f32) + mrow(M_BFF1, FF_DIM)
    # TODO(synk): HF/torch RoBERTa GELU is the exact erf form; tanh approximation used here.
    ff = jax.nn.gelu(ff, approximate=True)
    ff = jnp.dot(ff.astype(bf16), w_big_ref[R_FF2:R_FF2 + FF_DIM, 0:H],
                 preferred_element_type=f32) + mrow(M_BFF2, H)
    x = layer_norm(x + ff.reshape(B, S, H), M_LN2_G, M_LN2_B)

    # ---- tanh pooler on [CLS]; dropout(p=0.3) is identity at inference ----
    cls = x[:, 0, :].astype(bf16)                                               # [B, H]
    pooled = jnp.tanh(jnp.dot(cls, w_h_ref[:, PO:PO + H],
                              preferred_element_type=f32) + mrow(M_BPOOL, H))   # [B, H]

    # ---- numerical channel: 3x Conv1d('same') -> ReLU -> global max, as ONE Toeplitz matmul ----
    numb = num_ref[...].astype(bf16)                                            # [B, F]
    convf = jnp.dot(numb, w_convT_ref[...], preferred_element_type=f32)         # [B, F*128]
    m = convf[:, 0:128]                                  # max over output positions: 128-aligned slices
    for i in range(1, NUM_FEATS):
        m = jnp.maximum(m, convf[:, i * 128:(i + 1) * 128])
    conv_pool = jnp.maximum(m + mrow(M_BCONV), 0.0)      # [B, 128]; lanes 96:128 exactly zero

    # ---- num_fc: Linear(96,128) -> ReLU -> (Dropout) -> Linear(128,64) -> ReLU ----
    h1 = jnp.maximum(jnp.dot(conv_pool.astype(bf16), w_big_ref[R_NUM1:R_NUM1 + 128, :],
                             preferred_element_type=f32) + mrow(M_BNUM1), 0.0)
    num_out = jnp.maximum(jnp.dot(h1.astype(bf16), w_big_ref[R_NUM2:R_NUM2 + 128, :],
                                  preferred_element_type=f32) + mrow(M_BNUM2), 0.0)
    # num_out lanes 64:128 are exactly zero (zero weight cols + zero bias)

    # ---- classifier: concat([pooled, num_out]) @ Wc1 rewritten as two matmuls into one accumulator ----
    hc = jnp.maximum(
        jnp.dot(pooled.astype(bf16), w_big_ref[R_CLS1P:R_CLS1P + H, :], preferred_element_type=f32)
        + jnp.dot(num_out.astype(bf16), w_big_ref[R_CLS1N:R_CLS1N + 128, :], preferred_element_type=f32)
        + mrow(M_BCLS1), 0.0)
    # (Dropout) -> Linear(128, num_labels), lane-dense padded to 128 columns
    out_ref[...] = jnp.dot(hc.astype(bf16), w_big_ref[R_CLS2:R_CLS2 + 128, :],
                           preferred_element_type=f32) + mrow(M_BCLS2)


# ---------------- parameters (deterministic synthetic init, PyTorch-shaped) ----------------

def init_params(key):
    keys = iter(jax.random.split(key, 64))

    def w(shape, scale=0.05):
        return (scale * jax.random.normal(next(keys), shape)).astype(jnp.float32)

    zeros = lambda s: jnp.zeros(s, jnp.float32)
    ones = lambda s: jnp.ones(s, jnp.float32)

    r = {}
    # synthetic roberta stand-in
    r['tok_emb'] = w((VOCAB, HIDDEN))
    r['pos_emb'] = w((SEQ, HIDDEN))
    r['ln_e_g'], r['ln_e_b'] = ones((HIDDEN,)), zeros((HIDDEN,))
    for n in ('q', 'k', 'v', 'o'):
        r[f'w{n}'], r[f'b{n}'] = w((HIDDEN, HIDDEN)), zeros((HIDDEN,))
    r['ln1_g'], r['ln1_b'] = ones((HIDDEN,)), zeros((HIDDEN,))
    r['wff1'], r['bff1'] = w((HIDDEN, FF_DIM)), zeros((FF_DIM,))
    r['wff2'], r['bff2'] = w((FF_DIM, HIDDEN)), zeros((HIDDEN,))
    r['ln2_g'], r['ln2_b'] = ones((HIDDEN,)), zeros((HIDDEN,))
    r['wp'], r['bp'] = w((HIDDEN, HIDDEN)), zeros((HIDDEN,))
    # conv branches (weights stored as [k, C_out]; in_channels == 1 folded)
    r['w3'], r['b3'] = w((3, CONV_C)), zeros((CONV_C,))
    r['w5'], r['b5'] = w((5, CONV_C)), zeros((CONV_C,))
    r['w7'], r['b7'] = w((7, CONV_C)), zeros((CONV_C,))
    # num_fc
    r['w1'], r['b1'] = w((3 * CONV_C, 128)), zeros((128,))
    r['w2'], r['b2'] = w((128, 64)), zeros((64,))
    # classifier
    r['wc1'], r['bc1'] = w((HIDDEN + 64, 128)), zeros((128,))
    r['wc2'], r['bc2'] = w((128, NUM_LABELS)), zeros((NUM_LABELS,))
    return r


def pack_params(r):
    """Pack per-layer tensors into a few lane/sublane-aligned, bf16 VMEM slabs."""
    H = HIDDEN
    inv_sqrt_d = 1.0 / float(HEAD_DIM) ** 0.5

    # -- w_h slab [H, 768]: 128-aligned lane offsets; attention scale folded into Wq --
    w_h = jnp.zeros((H, W_H_COLS), jnp.float32)
    w_h = w_h.at[:, QO:QO + H].set(r['wq'] * inv_sqrt_d)
    w_h = w_h.at[:, KO:KO + H].set(r['wk'])
    w_h = w_h.at[:, VO:VO + H].set(r['wv'])
    w_h = w_h.at[:, OO:OO + H].set(r['wo'])
    w_h = w_h.at[:, F1O:F1O + FF_DIM].set(r['wff1'])
    w_h = w_h.at[:, PO:PO + H].set(r['wp'])

    # -- embedding slab [128 + SEQ, H] --
    emb = jnp.zeros((VOCAB_PAD + SEQ, H), jnp.float32)
    emb = emb.at[:VOCAB, :].set(r['tok_emb'])
    emb = emb.at[VOCAB_PAD:, :].set(r['pos_emb'])

    # -- conv branches -> im2col taps [8, 128] -> Toeplitz weight [F, F*128] (built at pack time) --
    w_tap = jnp.zeros((NUM_TAPS, 128), jnp.float32)
    w_tap = w_tap.at[2:5, 0:CONV_C].set(r['w3'])                  # k=3, padding=1
    w_tap = w_tap.at[1:6, CONV_C:2 * CONV_C].set(r['w5'])         # k=5, padding=2
    w_tap = w_tap.at[0:7, 2 * CONV_C:3 * CONV_C].set(r['w7'])     # k=7, padding=3
    # w_convT[j, i*128 + c] = w_tap[j - i + 3, c]  (|j - i| <= 3), so out[b,i,c] = sum_j num[b,j]*...
    d_idx = (jnp.arange(NUM_FEATS)[:, None] - jnp.arange(NUM_FEATS)[None, :]) + 3
    valid = (d_idx >= 0) & (d_idx <= 6)
    w_convT = jnp.where(valid[:, :, None], w_tap[jnp.clip(d_idx, 0, NUM_TAPS - 1)], 0.0)
    w_convT = w_convT.reshape(NUM_FEATS, NUM_FEATS * 128)

    # -- w_big slab [608, 128]: num_fc / classifier / ff2 weights --
    w_big = jnp.zeros((W_BIG_ROWS, 128), jnp.float32)
    w_big = w_big.at[R_NUM1:R_NUM1 + 3 * CONV_C, :].set(r['w1'])           # rows 96:128 stay zero
    w_big = w_big.at[R_NUM2:R_NUM2 + 128, 0:64].set(r['w2'])               # cols 64:  stay zero
    w_big = w_big.at[R_CLS1P:R_CLS1P + H, :].set(r['wc1'][:H, :])
    w_big = w_big.at[R_CLS1N:R_CLS1N + 64, :].set(r['wc1'][H:, :])         # rows 64:  stay zero
    w_big = w_big.at[R_CLS2:R_CLS2 + 128, 0:NUM_LABELS].set(r['wc2'])      # cols >=5  stay zero
    w_big = w_big.at[R_FF2:R_FF2 + FF_DIM, 0:H].set(r['wff2'])

    # -- misc slab [24, 128] f32: LN params + biases, one per row --
    misc = jnp.zeros((MISC_ROWS, 128), jnp.float32)
    rows = {
        M_LNE_G: r['ln_e_g'], M_LNE_B: r['ln_e_b'],
        M_LN1_G: r['ln1_g'], M_LN1_B: r['ln1_b'],
        M_LN2_G: r['ln2_g'], M_LN2_B: r['ln2_b'],
        M_BQ: r['bq'] * inv_sqrt_d, M_BK: r['bk'], M_BV: r['bv'], M_BO: r['bo'],
        M_BFF1: r['bff1'], M_BFF2: r['bff2'], M_BPOOL: r['bp'],
        M_BCONV: jnp.concatenate([r['b3'], r['b5'], r['b7']]),
        M_BNUM1: r['b1'], M_BNUM2: r['b2'], M_BCLS1: r['bc1'], M_BCLS2: r['bc2'],
    }
    for i, vrow in rows.items():
        misc = misc.at[i, :vrow.shape[0]].set(vrow)

    bf = lambda a: a.astype(jnp.bfloat16)
    return dict(emb=bf(emb), w_h=bf(w_h), w_convT=bf(w_convT), w_big=bf(w_big), misc=misc)


# ---------------- forward: one fused pallas_call, everything VMEM-resident ----------------

@jax.jit
def forward(pp, input_ids, attention_mask, numerical):
    B = input_ids.shape[0]
    ids2 = input_ids.reshape(-1, 1).astype(jnp.int32)              # [B*S, 1]
    args = (ids2,
            attention_mask.astype(jnp.int32),
            numerical.astype(jnp.float32),
            pp['emb'], pp['w_h'], pp['w_convT'], pp['w_big'], pp['misc'])

    logits_pad = pl.pallas_call(
        multimodal_kernel,
        out_shape=jax.ShapeDtypeStruct((B, OUT_PAD), jnp.float32),
        in_specs=[pl.BlockSpec(memory_space=pltpu.MemorySpace.VMEM) for _ in args],
        out_specs=pl.BlockSpec(memory_space=pltpu.MemorySpace.VMEM),
    )(*args)
    return logits_pad[:, :NUM_LABELS]


if __name__ == "__main__":
    key = jax.random.PRNGKey(0)
    k_param, k_ids, k_num = jax.random.split(key, 3)

    params = pack_params(init_params(k_param))

    input_ids = jax.random.randint(k_ids, (BATCH, SEQ), 0, VOCAB, dtype=jnp.int32)
    attention_mask = jnp.ones((BATCH, SEQ), jnp.int32).at[1, 6:].set(0)
    numerical = jax.random.normal(k_num, (BATCH, NUM_FEATS), dtype=jnp.float32)

    logits = jax.block_until_ready(forward(params, input_ids, attention_mask, numerical))

    assert logits.shape == (BATCH, NUM_LABELS), logits.shape
    assert bool(jnp.all(jnp.isfinite(logits)))
    print("KERNEL_OK")
</pallas_src>

<mosaic_0001>
module attributes {stable_mosaic.version = 11 : i64} {
  func.func @multimodal_kernel(%arg0: memref<16x1xi32, #tpu.memory_space<vmem>>, %arg1: memref<2x8xi32, #tpu.memory_space<vmem>>, %arg2: memref<2x16xf32, #tpu.memory_space<vmem>>, %arg3: memref<136x32xbf16, #tpu.memory_space<vmem>>, %arg4: memref<32x768xbf16, #tpu.memory_space<vmem>>, %arg5: memref<16x2048xbf16, #tpu.memory_space<vmem>>, %arg6: memref<608x128xbf16, #tpu.memory_space<vmem>>, %arg7: memref<24x128xf32, #tpu.memory_space<vmem>>, %arg8: memref<2x128xf32, #tpu.memory_space<vmem>>) attributes {dimension_semantics = [], scalar_prefetch = 0 : i64, scratch_operands = 0 : i64, tpu.core_type = #tpu.core_type<tc>} {
    %c0 = arith.constant 0 : index
    %c0_0 = arith.constant 0 : index
    %0 = vector.load %arg0[%c0, %c0_0] : memref<16x1xi32, #tpu.memory_space<vmem>>, vector<16x1xi32>
    %1 = tpu.iota {dimensions = array<i32: 1>} : vector<16x128xi32>
    %2 = vector.broadcast %0 : vector<16x1xi32> to vector<16x128xi32>
    %3 = arith.cmpi eq, %1, %2 : vector<16x128xi32>
    %cst = arith.constant 1.000000e+00 : f32
    %cst_1 = arith.constant 0.000000e+00 : f32
    %4 = vector.broadcast %cst : f32 to vector<16x128xf32>
    %5 = vector.broadcast %cst_1 : f32 to vector<16x128xf32>
    %6 = arith.select %3, %4, %5 : vector<16x128xi1>, vector<16x128xf32>
    %7 = arith.truncf %6 : vector<16x128xf32> to vector<16x128xbf16>
    %c0_2 = arith.constant 0 : index
    %c0_3 = arith.constant 0 : index
    %8 = vector.load %arg3[%c0_2, %c0_3] : memref<136x32xbf16, #tpu.memory_space<vmem>>, vector<128x32xbf16>
    %cst_4 = arith.constant dense<0.000000e+00> : vector<16x32xf32>
    %9 = tpu.matmul %7, %8, %cst_4 {dimension_numbers = #tpu.dot_dimension_numbers<[1], [0], [0], [1], [0, 0, 1, 1], [], []>} : vector<16x128xbf16>, vector<128x32xbf16>, vector<16x32xf32> -> vector<16x32xf32>
    %c128 = arith.constant 128 : index
    %c0_5 = arith.constant 0 : index
    %10 = vector.load %arg3[%c128, %c0_5] : memref<136x32xbf16, #tpu.memory_space<vmem>>, vector<8x32xbf16>
    %11 = arith.extf %10 : vector<8x32xbf16> to vector<8x32xf32>
    %12 = vector.shape_cast %9 : vector<16x32xf32> to vector<2x8x32xf32>
    %13 = vector.shape_cast %11 : vector<8x32xf32> to vector<1x8x32xf32>
    %14 = vector.broadcast %13 : vector<1x8x32xf32> to vector<2x8x32xf32>
    %15 = arith.addf %12, %14 : vector<2x8x32xf32>
    %c0_6 = arith.constant 0 : index
    %c0_7 = arith.constant 0 : index
    %16 = vector.load %arg7[%c0_6, %c0_7] : memref<24x128xf32, #tpu.memory_space<vmem>>, vector<1x32xf32>
    %c1 = arith.constant 1 : index
    %c0_8 = arith.constant 0 : index
    %17 = vector.load %arg7[%c1, %c0_8] : memref<24x128xf32, #tpu.memory_space<vmem>>, vector<1x32xf32>
    %cst_9 = arith.constant dense<0.000000e+00> : vector<2x8xf32>
    %18 = vector.multi_reduction <add>, %15, %cst_9 [2] : vector<2x8x32xf32> to vector<2x8xf32>
    %19 = vector.shape_cast %18 : vector<2x8xf32> to vector<2x8x1xf32>
    %cst_10 = arith.constant 3.200000e+01 : f32
    %20 = vector.broadcast %cst_10 : f32 to vector<2x8x1xf32>
    %21 = arith.divf %19, %20 : vector<2x8x1xf32>
    %22 = vector.broadcast %21 : vector<2x8x1xf32> to vector<2x8x32xf32>
    %23 = arith.subf %15, %22 : vector<2x8x32xf32>
    %24 = arith.mulf %23, %23 : vector<2x8x32xf32>
    %cst_11 = arith.constant dense<0.000000e+00> : vector<2x8xf32>
    %25 = vector.multi_reduction <add>, %24, %cst_11 [2] : vector<2x8x32xf32> to vector<2x8xf32>
    %26 = vector.shape_cast %25 : vector<2x8xf32> to vector<2x8x1xf32>
    %cst_12 = arith.constant 3.200000e+01 : f32
    %27 = vector.broadcast %cst_12 : f32 to vector<2x8x1xf32>
    %28 = arith.divf %26, %27 : vector<2x8x1xf32>
    %29 = vector.broadcast %21 : vector<2x8x1xf32> to vector<2x8x32xf32>
    %30 = arith.subf %15, %29 : vector<2x8x32xf32>
    %cst_13 = arith.constant 9.99999974E-6 : f32
    %31 = vector.broadcast %cst_13 : f32 to vector<2x8x1xf32>
    %32 = arith.addf %28, %31 : vector<2x8x1xf32>
    %33 = math.rsqrt %32 : vector<2x8x1xf32>
    %34 = vector.broadcast %33 : vector<2x8x1xf32> to vector<2x8x32xf32>
    %35 = arith.mulf %30, %34 : vector<2x8x32xf32>
    %36 = vector.shape_cast %16 : vector<1x32xf32> to vector<1x1x32xf32>
    %37 = vector.broadcast %36 : vector<1x1x32xf32> to vector<2x8x32xf32>
    %38 = arith.mulf %35, %37 : vector<2x8x32xf32>
    %39 = vector.shape_cast %17 : vector<1x32xf32> to vector<1x1x32xf32>
    %40 = vector.broadcast %39 : vector<1x1x32xf32> to vector<2x8x32xf32>
    %41 = arith.addf %38, %40 : vector<2x8x32xf32>
    %42 = vector.shape_cast %41 : vector<2x8x32xf32> to vector<16x32xf32>
    %43 = arith.truncf %42 : vector<16x32xf32> to vector<16x32xbf16>
    %c0_14 = arith.constant 0 : index
    %c0_15 = arith.constant 0 : index
    %44 = vector.load %arg4[%c0_14, %c0_15] : memref<32x768xbf16, #tpu.memory_space<vmem>>, vector<32x32xbf16>
    %cst_16 = arith.constant dense<0.000000e+00> : vector<16x32xf32>
    %45 = tpu.matmul %43, %44, %cst_16 {dimension_numbers = #tpu.dot_dimension_numbers<[1], [0], [0], [1], [0, 0, 1, 1], [], []>} : vector<16x32xbf16>, vector<32x32xbf16>, vector<16x32xf32> -> vector<16x32xf32>
    %c6 = arith.constant 6 : index
    %c0_17 = arith.constant 0 : index
    %46 = vector.load %arg7[%c6, %c0_17] : memref<24x128xf32, #tpu.memory_space<vmem>>, vector<1x32xf32>
    %47 = vector.broadcast %46 : vector<1x32xf32> to vector<16x32xf32>
    %48 = arith.addf %45, %47 : vector<16x32xf32>
    %c0_18 = arith.constant 0 : index
    %c128_19 = arith.constant 128 : index
    %49 = vector.load %arg4[%c0_18, %c128_19] : memref<32x768xbf16, #tpu.memory_space<vmem>>, vector<32x32xbf16>
    %cst_20 = arith.constant dense<0.000000e+00> : vector<16x32xf32>
    %50 = tpu.matmul %43, %49, %cst_20 {dimension_numbers = #tpu.dot_dimension_numbers<[1], [0], [0], [1], [0, 0, 1, 1], [], []>} : vector<16x32xbf16>, vector<32x32xbf16>, vector<16x32xf32> -> vector<16x32xf32>
    %c7 = arith.constant 7 : index
    %c0_21 = arith.constant 0 : index
    %51 = vector.load %arg7[%c7, %c0_21] : memref<24x128xf32, #tpu.memory_space<vmem>>, vector<1x32xf32>
    %52 = vector.broadcast %51 : vector<1x32xf32> to vector<16x32xf32>
    %53 = arith.addf %50, %52 : vector<16x32xf32>
    %c0_22 = arith.constant 0 : index
    %c256 = arith.constant 256 : index
    %54 = vector.load %arg4[%c0_22, %c256] : memref<32x768xbf16, #tpu.memory_space<vmem>>, vector<32x32xbf16>
    %cst_23 = arith.constant dense<0.000000e+00> : vector<16x32xf32>
    %55 = tpu.matmul %43, %54, %cst_23 {dimension_numbers = #tpu.dot_dimension_numbers<[1], [0], [0], [1], [0, 0, 1, 1], [], []>} : vector<16x32xbf16>, vector<32x32xbf16>, vector<16x32xf32> -> vector<16x32xf32>
    %c8 = arith.constant 8 : index
    %c0_24 = arith.constant 0 : index
    %56 = vector.load %arg7[%c8, %c0_24] : memref<24x128xf32, #tpu.memory_space<vmem>>, vector<1x32xf32>
    %57 = vector.broadcast %56 : vector<1x32xf32> to vector<16x32xf32>
    %58 = arith.addf %55, %57 : vector<16x32xf32>
    %59 = vector.shape_cast %48 : vector<16x32xf32> to vector<2x8x32xf32>
    %60 = vector.shape_cast %53 : vector<16x32xf32> to vector<2x8x32xf32>
    %61 = vector.shape_cast %58 : vector<16x32xf32> to vector<2x8x32xf32>
    %c0_25 = arith.constant 0 : index
    %c0_26 = arith.constant 0 : index
    %62 = vector.load %arg1[%c0_25, %c0_26] : memref<2x8xi32, #tpu.memory_space<vmem>>, vector<2x8xi32>
    %63 = arith.sitofp %62 : vector<2x8xi32> to vector<2x8xf32>
    %cst_27 = arith.constant 1.000000e+00 : f32
    %64 = vector.broadcast %cst_27 : f32 to vector<2x8xf32>
    %65 = arith.subf %63, %64 : vector<2x8xf32>
    %cst_28 = arith.constant 1.000000e+09 : f32
    %66 = vector.broadcast %cst_28 : f32 to vector<2x8xf32>
    %67 = arith.mulf %65, %66 : vector<2x8xf32>
    %68 = vector.shape_cast %67 : vector<2x8xf32> to vector<2x1x8xf32>
    %69 = vector.extract_strided_slice %59 {offsets = [0, 0, 0], sizes = [2, 8, 8], strides = [1, 1, 1]} : vector<2x8x32xf32> to vector<2x8x8xf32>
    %70 = vector.extract_strided_slice %60 {offsets = [0, 0, 0], sizes = [2, 8, 8], strides = [1, 1, 1]} : vector<2x8x32xf32> to vector<2x8x8xf32>
    %71 = vector.extract_strided_slice %61 {offsets = [0, 0, 0], sizes = [2, 8, 8], strides = [1, 1, 1]} : vector<2x8x32xf32> to vector<2x8x8xf32>
    "tpu.trace_start"() <{level = 10 : i32, message = "bqd,bkd->bqk"}> : () -> ()
    %cst_29 = arith.constant dense<0.000000e+00> : vector<2x8x8xf32>
    %72 = tpu.matmul %69, %70, %cst_29 {dimension_numbers = #tpu.dot_dimension_numbers<[2], [2], [1], [1], [0, 0, 0, 1, 1, 1], [0], [0]>} : vector<2x8x8xf32>, vector<2x8x8xf32>, vector<2x8x8xf32> -> vector<2x8x8xf32>
    "tpu.trace_stop"() : () -> ()
    %73 = vector.broadcast %68 : vector<2x1x8xf32> to vector<2x8x8xf32>
    %74 = arith.addf %72, %73 : vector<2x8x8xf32>
    %cst_30 = arith.constant dense<0xFF800000> : vector<2x8xf32>
    %75 = vector.multi_reduction <maximumf>, %74, %cst_30 [2] : vector<2x8x8xf32> to vector<2x8xf32>
    %76 = vector.shape_cast %75 : vector<2x8xf32> to vector<2x8x1xf32>
    %77 = vector.broadcast %76 : vector<2x8x1xf32> to vector<2x8x8xf32>
    %78 = arith.subf %74, %77 : vector<2x8x8xf32>
    %79 = math.exp %78 : vector<2x8x8xf32>
    %cst_31 = arith.constant dense<0.000000e+00> : vector<2x8xf32>
    %80 = vector.multi_reduction <add>, %79, %cst_31 [2] : vector<2x8x8xf32> to vector<2x8xf32>
    %81 = vector.shape_cast %80 : vector<2x8xf32> to vector<2x8x1xf32>
    %82 = tpu.reciprocal %81 {approx = true} : vector<2x8x1xf32> -> vector<2x8x1xf32>
    %83 = vector.broadcast %82 : vector<2x8x1xf32> to vector<2x8x8xf32>
    %84 = arith.mulf %79, %83 : vector<2x8x8xf32>
    "tpu.trace_start"() <{level = 10 : i32, message = "bqk,bkd->bqd"}> : () -> ()
    %cst_32 = arith.constant dense<0.000000e+00> : vector<2x8x8xf32>
    %85 = tpu.matmul %84, %71, %cst_32 {dimension_numbers = #tpu.dot_dimension_numbers<[2], [1], [1], [2], [0, 0, 0, 1, 1, 2], [0], [0]>} : vector<2x8x8xf32>, vector<2x8x8xf32>, vector<2x8x8xf32> -> vector<2x8x8xf32>
    "tpu.trace_stop"() : () -> ()
    %86 = vector.extract_strided_slice %59 {offsets = [0, 0, 8], sizes = [2, 8, 8], strides = [1, 1, 1]} : vector<2x8x32xf32> to vector<2x8x8xf32>
    %87 = vector.extract_strided_slice %60 {offsets = [0, 0, 8], sizes = [2, 8, 8], strides = [1, 1, 1]} : vector<2x8x32xf32> to vector<2x8x8xf32>
    %88 = vector.extract_strided_slice %61 {offsets = [0, 0, 8], sizes = [2, 8, 8], strides = [1, 1, 1]} : vector<2x8x32xf32> to vector<2x8x8xf32>
    "tpu.trace_start"() <{level = 10 : i32, message = "bqd,bkd->bqk"}> : () -> ()
    %cst_33 = arith.constant dense<0.000000e+00> : vector<2x8x8xf32>
    %89 = tpu.matmul %86, %87, %cst_33 {dimension_numbers = #tpu.dot_dimension_numbers<[2], [2], [1], [1], [0, 0, 0, 1, 1, 1], [0], [0]>} : vector<2x8x8xf32>, vector<2x8x8xf32>, vector<2x8x8xf32> -> vector<2x8x8xf32>
    "tpu.trace_stop"() : () -> ()
    %90 = vector.broadcast %68 : vector<2x1x8xf32> to vector<2x8x8xf32>
    %91 = arith.addf %89, %90 : vector<2x8x8xf32>
    %cst_34 = arith.constant dense<0xFF800000> : vector<2x8xf32>
    %92 = vector.multi_reduction <maximumf>, %91, %cst_34 [2] : vector<2x8x8xf32> to vector<2x8xf32>
    %93 = vector.shape_cast %92 : vector<2x8xf32> to vector<2x8x1xf32>
    %94 = vector.broadcast %93 : vector<2x8x1xf32> to vector<2x8x8xf32>
    %95 = arith.subf %91, %94 : vector<2x8x8xf32>
    %96 = math.exp %95 : vector<2x8x8xf32>
    %cst_35 = arith.constant dense<0.000000e+00> : vector<2x8xf32>
    %97 = vector.multi_reduction <add>, %96, %cst_35 [2] : vector<2x8x8xf32> to vector<2x8xf32>
    %98 = vector.shape_cast %97 : vector<2x8xf32> to vector<2x8x1xf32>
    %99 = tpu.reciprocal %98 {approx = true} : vector<2x8x1xf32> -> vector<2x8x1xf32>
    %100 = vector.broadcast %99 : vector<2x8x1xf32> to vector<2x8x8xf32>
    %101 = arith.mulf %96, %100 : vector<2x8x8xf32>
    "tpu.trace_start"() <{level = 10 : i32, message = "bqk,bkd->bqd"}> : () -> ()
    %cst_36 = arith.constant dense<0.000000e+00> : vector<2x8x8xf32>
    %102 = tpu.matmul %101, %88, %cst_36 {dimension_numbers = #tpu.dot_dimension_numbers<[2], [1], [1], [2], [0, 0, 0, 1, 1, 2], [0], [0]>} : vector<2x8x8xf32>, vector<2x8x8xf32>, vector<2x8x8xf32> -> vector<2x8x8xf32>
    "tpu.trace_stop"() : () -> ()
    %103 = vector.extract_strided_slice %59 {offsets = [0, 0, 16], sizes = [2, 8, 8], strides = [1, 1, 1]} : vector<2x8x32xf32> to vector<2x8x8xf32>
    %104 = vector.extract_strided_slice %60 {offsets = [0, 0, 16], sizes = [2, 8, 8], strides = [1, 1, 1]} : vector<2x8x32xf32> to vector<2x8x8xf32>
    %105 = vector.extract_strided_slice %61 {offsets = [0, 0, 16], sizes = [2, 8, 8], strides = [1, 1, 1]} : vector<2x8x32xf32> to vector<2x8x8xf32>
    "tpu.trace_start"() <{level = 10 : i32, message = "bqd,bkd->bqk"}> : () -> ()
    %cst_37 = arith.constant dense<0.000000e+00> : vector<2x8x8xf32>
    %106 = tpu.matmul %103, %104, %cst_37 {dimension_numbers = #tpu.dot_dimension_numbers<[2], [2], [1], [1], [0, 0, 0, 1, 1, 1], [0], [0]>} : vector<2x8x8xf32>, vector<2x8x8xf32>, vector<2x8x8xf32> -> vector<2x8x8xf32>
    "tpu.trace_stop"() : () -> ()
    %107 = vector.broadcast %68 : vector<2x1x8xf32> to vector<2x8x8xf32>
    %108 = arith.addf %106, %107 : vector<2x8x8xf32>
    %cst_38 = arith.constant dense<0xFF800000> : vector<2x8xf32>
    %109 = vector.multi_reduction <maximumf>, %108, %cst_38 [2] : vector<2x8x8xf32> to vector<2x8xf32>
    %110 = vector.shape_cast %109 : vector<2x8xf32> to vector<2x8x1xf32>
    %111 = vector.broadcast %110 : vector<2x8x1xf32> to vector<2x8x8xf32>
    %112 = arith.subf %108, %111 : vector<2x8x8xf32>
    %113 = math.exp %112 : vector<2x8x8xf32>
    %cst_39 = arith.constant dense<0.000000e+00> : vector<2x8xf32>
    %114 = vector.multi_reduction <add>, %113, %cst_39 [2] : vector<2x8x8xf32> to vector<2x8xf32>
    %115 = vector.shape_cast %114 : vector<2x8xf32> to vector<2x8x1xf32>
    %116 = tpu.reciprocal %115 {approx = true} : vector<2x8x1xf32> -> vector<2x8x1xf32>
    %117 = vector.broadcast %116 : vector<2x8x1xf32> to vector<2x8x8xf32>
    %118 = arith.mulf %113, %117 : vector<2x8x8xf32>
    "tpu.trace_start"() <{level = 10 : i32, message = "bqk,bkd->bqd"}> : () -> ()
    %cst_40 = arith.constant dense<0.000000e+00> : vector<2x8x8xf32>
    %119 = tpu.matmul %118, %105, %cst_40 {dimension_numbers = #tpu.dot_dimension_numbers<[2], [1], [1], [2], [0, 0, 0, 1, 1, 2], [0], [0]>} : vector<2x8x8xf32>, vector<2x8x8xf32>, vector<2x8x8xf32> -> vector<2x8x8xf32>
    "tpu.trace_stop"() : () -> ()
    %120 = vector.extract_strided_slice %59 {offsets = [0, 0, 24], sizes = [2, 8, 8], strides = [1, 1, 1]} : vector<2x8x32xf32> to vector<2x8x8xf32>
    %121 = vector.extract_strided_slice %60 {offsets = [0, 0, 24], sizes = [2, 8, 8], strides = [1, 1, 1]} : vector<2x8x32xf32> to vector<2x8x8xf32>
    %122 = vector.extract_strided_slice %61 {offsets = [0, 0, 24], sizes = [2, 8, 8], strides = [1, 1, 1]} : vector<2x8x32xf32> to vector<2x8x8xf32>
    "tpu.trace_start"() <{level = 10 : i32, message = "bqd,bkd->bqk"}> : () -> ()
    %cst_41 = arith.constant dense<0.000000e+00> : vector<2x8x8xf32>
    %123 = tpu.matmul %120, %121, %cst_41 {dimension_numbers = #tpu.dot_dimension_numbers<[2], [2], [1], [1], [0, 0, 0, 1, 1, 1], [0], [0]>} : vector<2x8x8xf32>, vector<2x8x8xf32>, vector<2x8x8xf32> -> vector<2x8x8xf32>
    "tpu.trace_stop"() : () -> ()
    %124 = vector.broadcast %68 : vector<2x1x8xf32> to vector<2x8x8xf32>
    %125 = arith.addf %123, %124 : vector<2x8x8xf32>
    %cst_42 = arith.constant dense<0xFF800000> : vector<2x8xf32>
    %126 = vector.multi_reduction <maximumf>, %125, %cst_42 [2] : vector<2x8x8xf32> to vector<2x8xf32>
    %127 = vector.shape_cast %126 : vector<2x8xf32> to vector<2x8x1xf32>
    %128 = vector.broadcast %127 : vector<2x8x1xf32> to vector<2x8x8xf32>
    %129 = arith.subf %125, %128 : vector<2x8x8xf32>
    %130 = math.exp %129 : vector<2x8x8xf32>
    %cst_43 = arith.constant dense<0.000000e+00> : vector<2x8xf32>
    %131 = vector.multi_reduction <add>, %130, %cst_43 [2] : vector<2x8x8xf32> to vector<2x8xf32>
    %132 = vector.shape_cast %131 : vector<2x8xf32> to vector<2x8x1xf32>
    %133 = tpu.reciprocal %132 {approx = true} : vector<2x8x1xf32> -> vector<2x8x1xf32>
    %134 = vector.broadcast %133 : vector<2x8x1xf32> to vector<2x8x8xf32>
    %135 = arith.mulf %130, %134 : vector<2x8x8xf32>
    "tpu.trace_start"() <{level = 10 : i32, message = "bqk,bkd->bqd"}> : () -> ()
    %cst_44 = arith.constant dense<0.000000e+00> : vector<2x8x8xf32>
    %136 = tpu.matmul %135, %122, %cst_44 {dimension_numbers = #tpu.dot_dimension_numbers<[2], [1], [1], [2], [0, 0, 0, 1, 1, 2], [0], [0]>} : vector<2x8x8xf32>, vector<2x8x8xf32>, vector<2x8x8xf32> -> vector<2x8x8xf32>
    "tpu.trace_stop"() : () -> ()
    %137 = tpu.concatenate %85, %102, %119, %136 in 2 : vector<2x8x8xf32>, vector<2x8x8xf32>, vector<2x8x8xf32>, vector<2x8x8xf32> -> vector<2x8x32xf32>
    %138 = vector.shape_cast %137 : vector<2x8x32xf32> to vector<16x32xf32>
    %139 = arith.truncf %138 : vector<16x32xf32> to vector<16x32xbf16>
    %c0_45 = arith.constant 0 : index
    %c384 = arith.constant 384 : index
    %140 = vector.load %arg4[%c0_45, %c384] : memref<32x768xbf16, #tpu.memory_space<vmem>>, vector<32x32xbf16>
    %cst_46 = arith.constant dense<0.000000e+00> : vector<16x32xf32>
    %141 = tpu.matmul %139, %140, %cst_46 {dimension_numbers = #tpu.dot_dimension_numbers<[1], [0], [0], [1], [0, 0, 1, 1], [], []>} : vector<16x32xbf16>, vector<32x32xbf16>, vector<16x32xf32> -> vector<16x32xf32>
    %c9 = arith.constant 9 : index
    %c0_47 = arith.constant 0 : index
    %142 = vector.load %arg7[%c9, %c0_47] : memref<24x128xf32, #tpu.memory_space<vmem>>, vector<1x32xf32>
    %143 = vector.broadcast %142 : vector<1x32xf32> to vector<16x32xf32>
    %144 = arith.addf %141, %143 : vector<16x32xf32>
    %145 = vector.shape_cast %144 : vector<16x32xf32> to vector<2x8x32xf32>
    %146 = arith.addf %41, %145 : vector<2x8x32xf32>
    %c2 = arith.constant 2 : index
    %c0_48 = arith.constant 0 : index
    %147 = vector.load %arg7[%c2, %c0_48] : memref<24x128xf32, #tpu.memory_space<vmem>>, vector<1x32xf32>
    %c3 = arith.constant 3 : index
    %c0_49 = arith.constant 0 : index
    %148 = vector.load %arg7[%c3, %c0_49] : memref<24x128xf32, #tpu.memory_space<vmem>>, vector<1x32xf32>
    %cst_50 = arith.constant dense<0.000000e+00> : vector<2x8xf32>
    %149 = vector.multi_reduction <add>, %146, %cst_50 [2] : vector<2x8x32xf32> to vector<2x8xf32>
    %150 = vector.shape_cast %149 : vector<2x8xf32> to vector<2x8x1xf32>
    %cst_51 = arith.constant 3.200000e+01 : f32
    %151 = vector.broadcast %cst_51 : f32 to vector<2x8x1xf32>
    %152 = arith.divf %150, %151 : vector<2x8x1xf32>
    %153 = vector.broadcast %152 : vector<2x8x1xf32> to vector<2x8x32xf32>
    %154 = arith.subf %146, %153 : vector<2x8x32xf32>
    %155 = arith.mulf %154, %154 : vector<2x8x32xf32>
    %cst_52 = arith.constant dense<0.000000e+00> : vector<2x8xf32>
    %156 = vector.multi_reduction <add>, %155, %cst_52 [2] : vector<2x8x32xf32> to vector<2x8xf32>
    %157 = vector.shape_cast %156 : vector<2x8xf32> to vector<2x8x1xf32>
    %cst_53 = arith.constant 3.200000e+01 : f32
    %158 = vector.broadcast %cst_53 : f32 to vector<2x8x1xf32>
    %159 = arith.divf %157, %158 : vector<2x8x1xf32>
    %160 = vector.broadcast %152 : vector<2x8x1xf32> to vector<2x8x32xf32>
    %161 = arith.subf %146, %160 : vector<2x8x32xf32>
    %cst_54 = arith.constant 9.99999974E-6 : f32
    %162 = vector.broadcast %cst_54 : f32 to vector<2x8x1xf32>
    %163 = arith.addf %159, %162 : vector<2x8x1xf32>
    %164 = math.rsqrt %163 : vector<2x8x1xf32>
    %165 = vector.broadcast %164 : vector<2x8x1xf32> to vector<2x8x32xf32>
    %166 = arith.mulf %161, %165 : vector<2x8x32xf32>
    %167 = vector.shape_cast %147 : vector<1x32xf32> to vector<1x1x32xf32>
    %168 = vector.broadcast %167 : vector<1x1x32xf32> to vector<2x8x32xf32>
    %169 = arith.mulf %166, %168 : vector<2x8x32xf32>
    %170 = vector.shape_cast %148 : vector<1x32xf32> to vector<1x1x32xf32>
    %171 = vector.broadcast %170 : vector<1x1x32xf32> to vector<2x8x32xf32>
    %172 = arith.addf %169, %171 : vector<2x8x32xf32>
    %173 = vector.shape_cast %172 : vector<2x8x32xf32> to vector<16x32xf32>
    %174 = arith.truncf %173 : vector<16x32xf32> to vector<16x32xbf16>
    %c0_55 = arith.constant 0 : index
    %c512 = arith.constant 512 : index
    %175 = vector.load %arg4[%c0_55, %c512] : memref<32x768xbf16, #tpu.memory_space<vmem>>, vector<32x64xbf16>
    %cst_56 = arith.constant dense<0.000000e+00> : vector<16x64xf32>
    %176 = tpu.matmul %174, %175, %cst_56 {dimension_numbers = #tpu.dot_dimension_numbers<[1], [0], [0], [1], [0, 0, 1, 1], [], []>} : vector<16x32xbf16>, vector<32x64xbf16>, vector<16x64xf32> -> vector<16x64xf32>
    %c10 = arith.constant 10 : index
    %c0_57 = arith.constant 0 : index
    %177 = vector.load %arg7[%c10, %c0_57] : memref<24x128xf32, #tpu.memory_space<vmem>>, vector<1x64xf32>
    %178 = vector.broadcast %177 : vector<1x64xf32> to vector<16x64xf32>
    %179 = arith.addf %176, %178 : vector<16x64xf32>
    %180 = arith.mulf %179, %179 : vector<16x64xf32>
    %181 = arith.mulf %179, %180 : vector<16x64xf32>
    %cst_58 = arith.constant 4.471500e-02 : f32
    %182 = vector.broadcast %cst_58 : f32 to vector<16x64xf32>
    %183 = arith.mulf %182, %181 : vector<16x64xf32>
    %184 = arith.addf %179, %183 : vector<16x64xf32>
    %cst_59 = arith.constant 0.797884583 : f32
    %185 = vector.broadcast %cst_59 : f32 to vector<16x64xf32>
    %186 = arith.mulf %185, %184 : vector<16x64xf32>
    %187 = math.tanh %186 : vector<16x64xf32>
    %cst_60 = arith.constant 1.000000e+00 : f32
    %188 = vector.broadcast %cst_60 : f32 to vector<16x64xf32>
    %189 = arith.addf %188, %187 : vector<16x64xf32>
    %cst_61 = arith.constant 5.000000e-01 : f32
    %190 = vector.broadcast %cst_61 : f32 to vector<16x64xf32>
    %191 = arith.mulf %190, %189 : vector<16x64xf32>
    %192 = arith.mulf %179, %191 : vector<16x64xf32>
    %193 = arith.truncf %192 : vector<16x64xf32> to vector<16x64xbf16>
    %c544 = arith.constant 544 : index
    %c0_62 = arith.constant 0 : index
    %194 = vector.load %arg6[%c544, %c0_62] : memref<608x128xbf16, #tpu.memory_space<vmem>>, vector<64x32xbf16>
    %cst_63 = arith.constant dense<0.000000e+00> : vector<16x32xf32>
    %195 = tpu.matmul %193, %194, %cst_63 {dimension_numbers = #tpu.dot_dimension_numbers<[1], [0], [0], [1], [0, 0, 1, 1], [], []>} : vector<16x64xbf16>, vector<64x32xbf16>, vector<16x32xf32> -> vector<16x32xf32>
    %c11 = arith.constant 11 : index
    %c0_64 = arith.constant 0 : index
    %196 = vector.load %arg7[%c11, %c0_64] : memref<24x128xf32, #tpu.memory_space<vmem>>, vector<1x32xf32>
    %197 = vector.broadcast %196 : vector<1x32xf32> to vector<16x32xf32>
    %198 = arith.addf %195, %197 : vector<16x32xf32>
    %199 = vector.shape_cast %198 : vector<16x32xf32> to vector<2x8x32xf32>
    %200 = arith.addf %172, %199 : vector<2x8x32xf32>
    %c4 = arith.constant 4 : index
    %c0_65 = arith.constant 0 : index
    %201 = vector.load %arg7[%c4, %c0_65] : memref<24x128xf32, #tpu.memory_space<vmem>>, vector<1x32xf32>
    %c5 = arith.constant 5 : index
    %c0_66 = arith.constant 0 : index
    %202 = vector.load %arg7[%c5, %c0_66] : memref<24x128xf32, #tpu.memory_space<vmem>>, vector<1x32xf32>
    %cst_67 = arith.constant dense<0.000000e+00> : vector<2x8xf32>
    %203 = vector.multi_reduction <add>, %200, %cst_67 [2] : vector<2x8x32xf32> to vector<2x8xf32>
    %204 = vector.shape_cast %203 : vector<2x8xf32> to vector<2x8x1xf32>
    %cst_68 = arith.constant 3.200000e+01 : f32
    %205 = vector.broadcast %cst_68 : f32 to vector<2x8x1xf32>
    %206 = arith.divf %204, %205 : vector<2x8x1xf32>
    %207 = vector.broadcast %206 : vector<2x8x1xf32> to vector<2x8x32xf32>
    %208 = arith.subf %200, %207 : vector<2x8x32xf32>
    %209 = arith.mulf %208, %208 : vector<2x8x32xf32>
    %cst_69 = arith.constant dense<0.000000e+00> : vector<2x8xf32>
    %210 = vector.multi_reduction <add>, %209, %cst_69 [2] : vector<2x8x32xf32> to vector<2x8xf32>
    %211 = vector.shape_cast %210 : vector<2x8xf32> to vector<2x8x1xf32>
    %cst_70 = arith.constant 3.200000e+01 : f32
    %212 = vector.broadcast %cst_70 : f32 to vector<2x8x1xf32>
    %213 = arith.divf %211, %212 : vector<2x8x1xf32>
    %214 = vector.broadcast %206 : vector<2x8x1xf32> to vector<2x8x32xf32>
    %215 = arith.subf %200, %214 : vector<2x8x32xf32>
    %cst_71 = arith.constant 9.99999974E-6 : f32
    %216 = vector.broadcast %cst_71 : f32 to vector<2x8x1xf32>
    %217 = arith.addf %213, %216 : vector<2x8x1xf32>
    %218 = math.rsqrt %217 : vector<2x8x1xf32>
    %219 = vector.broadcast %218 : vector<2x8x1xf32> to vector<2x8x32xf32>
    %220 = arith.mulf %215, %219 : vector<2x8x32xf32>
    %221 = vector.shape_cast %201 : vector<1x32xf32> to vector<1x1x32xf32>
    %222 = vector.broadcast %221 : vector<1x1x32xf32> to vector<2x8x32xf32>
    %223 = arith.mulf %220, %222 : vector<2x8x32xf32>
    %224 = vector.shape_cast %202 : vector<1x32xf32> to vector<1x1x32xf32>
    %225 = vector.broadcast %224 : vector<1x1x32xf32> to vector<2x8x32xf32>
    %226 = arith.addf %223, %225 : vector<2x8x32xf32>
    %227 = vector.extract_strided_slice %226 {offsets = [0, 0, 0], sizes = [2, 1, 32], strides = [1, 1, 1]} : vector<2x8x32xf32> to vector<2x1x32xf32>
    %228 = vector.shape_cast %227 : vector<2x1x32xf32> to vector<2x32xf32>
    %229 = arith.truncf %228 : vector<2x32xf32> to vector<2x32xbf16>
    %c0_72 = arith.constant 0 : index
    %c640 = arith.constant 640 : index
    %230 = vector.load %arg4[%c0_72, %c640] : memref<32x768xbf16, #tpu.memory_space<vmem>>, vector<32x32xbf16>
    %cst_73 = arith.constant dense<0.000000e+00> : vector<2x32xf32>
    %231 = tpu.matmul %229, %230, %cst_73 {dimension_numbers = #tpu.dot_dimension_numbers<[1], [0], [0], [1], [0, 0, 1, 1], [], []>} : vector<2x32xbf16>, vector<32x32xbf16>, vector<2x32xf32> -> vector<2x32xf32>
    %c12 = arith.constant 12 : index
    %c0_74 = arith.constant 0 : index
    %232 = vector.load %arg7[%c12, %c0_74] : memref<24x128xf32, #tpu.memory_space<vmem>>, vector<1x32xf32>
    %233 = vector.broadcast %232 : vector<1x32xf32> to vector<2x32xf32>
    %234 = arith.addf %231, %233 : vector<2x32xf32>
    %235 = math.tanh %234 : vector<2x32xf32>
    %c0_75 = arith.constant 0 : index
    %c0_76 = arith.constant 0 : index
    %236 = vector.load %arg2[%c0_75, %c0_76] : memref<2x16xf32, #tpu.memory_space<vmem>>, vector<2x16xf32>
    %237 = arith.truncf %236 : vector<2x16xf32> to vector<2x16xbf16>
    %c0_77 = arith.constant 0 : index
    %c0_78 = arith.constant 0 : index
    %238 = vector.load %arg5[%c0_77, %c0_78] : memref<16x2048xbf16, #tpu.memory_space<vmem>>, vector<16x2048xbf16>
    %cst_79 = arith.constant dense<0.000000e+00> : vector<2x2048xf32>
    %239 = tpu.matmul %237, %238, %cst_79 {dimension_numbers = #tpu.dot_dimension_numbers<[1], [0], [0], [1], [0, 0, 1, 1], [], []>} : vector<2x16xbf16>, vector<16x2048xbf16>, vector<2x2048xf32> -> vector<2x2048xf32>
    %240 = vector.extract_strided_slice %239 {offsets = [0, 0], sizes = [2, 128], strides = [1, 1]} : vector<2x2048xf32> to vector<2x128xf32>
    %241 = vector.extract_strided_slice %239 {offsets = [0, 128], sizes = [2, 128], strides = [1, 1]} : vector<2x2048xf32> to vector<2x128xf32>
    %242 = arith.maximumf %240, %241 : vector<2x128xf32>
    %243 = vector.extract_strided_slice %239 {offsets = [0, 256], sizes = [2, 128], strides = [1, 1]} : vector<2x2048xf32> to vector<2x128xf32>
    %244 = arith.maximumf %242, %243 : vector<2x128xf32>
    %245 = vector.extract_strided_slice %239 {offsets = [0, 384], sizes = [2, 128], strides = [1, 1]} : vector<2x2048xf32> to vector<2x128xf32>
    %246 = arith.maximumf %244, %245 : vector<2x128xf32>
    %247 = vector.extract_strided_slice %239 {offsets = [0, 512], sizes = [2, 128], strides = [1, 1]} : vector<2x2048xf32> to vector<2x128xf32>
    %248 = arith.maximumf %246, %247 : vector<2x128xf32>
    %249 = vector.extract_strided_slice %239 {offsets = [0, 640], sizes = [2, 128], strides = [1, 1]} : vector<2x2048xf32> to vector<2x128xf32>
    %250 = arith.maximumf %248, %249 : vector<2x128xf32>
    %251 = vector.extract_strided_slice %239 {offsets = [0, 768], sizes = [2, 128], strides = [1, 1]} : vector<2x2048xf32> to vector<2x128xf32>
    %252 = arith.maximumf %250, %251 : vector<2x128xf32>
    %253 = vector.extract_strided_slice %239 {offsets = [0, 896], sizes = [2, 128], strides = [1, 1]} : vector<2x2048xf32> to vector<2x128xf32>
    %254 = arith.maximumf %252, %253 : vector<2x128xf32>
    %255 = vector.extract_strided_slice %239 {offsets = [0, 1024], sizes = [2, 128], strides = [1, 1]} : vector<2x2048xf32> to vector<2x128xf32>
    %256 = arith.maximumf %254, %255 : vector<2x128xf32>
    %257 = vector.extract_strided_slice %239 {offsets = [0, 1152], sizes = [2, 128], strides = [1, 1]} : vector<2x2048xf32> to vector<2x128xf32>
    %258 = arith.maximumf %256, %257 : vector<2x128xf32>
    %259 = vector.extract_strided_slice %239 {offsets = [0, 1280], sizes = [2, 128], strides = [1, 1]} : vector<2x2048xf32> to vector<2x128xf32>
    %260 = arith.maximumf %258, %259 : vector<2x128xf32>
    %261 = vector.extract_strided_slice %239 {offsets = [0, 1408], sizes = [2, 128], strides = [1, 1]} : vector<2x2048xf32> to vector<2x128xf32>
    %262 = arith.maximumf %260, %261 : vector<2x128xf32>
    %263 = vector.extract_strided_slice %239 {offsets = [0, 1536], sizes = [2, 128], strides = [1, 1]} : vector<2x2048xf32> to vector<2x128xf32>
    %264 = arith.maximumf %262, %263 : vector<2x128xf32>
    %265 = vector.extract_strided_slice %239 {offsets = [0, 1664], sizes = [2, 128], strides = [1, 1]} : vector<2x2048xf32> to vector<2x128xf32>
    %266 = arith.maximumf %264, %265 : vector<2x128xf32>
    %267 = vector.extract_strided_slice %239 {offsets = [0, 1792], sizes = [2, 128], strides = [1, 1]} : vector<2x2048xf32> to vector<2x128xf32>
    %268 = arith.maximumf %266, %267 : vector<2x128xf32>
    %269 = vector.extract_strided_slice %239 {offsets = [0, 1920], sizes = [2, 128], strides = [1, 1]} : vector<2x2048xf32> to vector<2x128xf32>
    %270 = arith.maximumf %268, %269 : vector<2x128xf32>
    %c13 = arith.constant 13 : index
    %c0_80 = arith.constant 0 : index
    %271 = vector.load %arg7[%c13, %c0_80] : memref<24x128xf32, #tpu.memory_space<vmem>>, vector<1x128xf32>
    %272 = vector.broadcast %271 : vector<1x128xf32> to vector<2x128xf32>
    %273 = arith.addf %270, %272 : vector<2x128xf32>
    %cst_81 = arith.constant 0.000000e+00 : f32
    %274 = vector.broadcast %cst_81 : f32 to vector<2x128xf32>
    %275 = arith.maximumf %273, %274 : vector<2x128xf32>
    %276 = arith.truncf %275 : vector<2x128xf32> to vector<2x128xbf16>
    %c0_82 = arith.constant 0 : index
    %c0_83 = arith.constant 0 : index
    %277 = vector.load %arg6[%c0_82, %c0_83] : memref<608x128xbf16, #tpu.memory_space<vmem>>, vector<128x128xbf16>
    %cst_84 = arith.constant dense<0.000000e+00> : vector<2x128xf32>
    %278 = tpu.matmul %276, %277, %cst_84 {dimension_numbers = #tpu.dot_dimension_numbers<[1], [0], [0], [1], [0, 0, 1, 1], [], []>} : vector<2x128xbf16>, vector<128x128xbf16>, vector<2x128xf32> -> vector<2x128xf32>
    %c14 = arith.constant 14 : index
    %c0_85 = arith.constant 0 : index
    %279 = vector.load %arg7[%c14, %c0_85] : memref<24x128xf32, #tpu.memory_space<vmem>>, vector<1x128xf32>
    %280 = vector.broadcast %279 : vector<1x128xf32> to vector<2x128xf32>
    %281 = arith.addf %278, %280 : vector<2x128xf32>
    %cst_86 = arith.constant 0.000000e+00 : f32
    %282 = vector.broadcast %cst_86 : f32 to vector<2x128xf32>
    %283 = arith.maximumf %281, %282 : vector<2x128xf32>
    %284 = arith.truncf %283 : vector<2x128xf32> to vector<2x128xbf16>
    %c128_87 = arith.constant 128 : index
    %c0_88 = arith.constant 0 : index
    %285 = vector.load %arg6[%c128_87, %c0_88] : memref<608x128xbf16, #tpu.memory_space<vmem>>, vector<128x128xbf16>
    %cst_89 = arith.constant dense<0.000000e+00> : vector<2x128xf32>
    %286 = tpu.matmul %284, %285, %cst_89 {dimension_numbers = #tpu.dot_dimension_numbers<[1], [0], [0], [1], [0, 0, 1, 1], [], []>} : vector<2x128xbf16>, vector<128x128xbf16>, vector<2x128xf32> -> vector<2x128xf32>
    %c15 = arith.constant 15 : index
    %c0_90 = arith.constant 0 : index
    %287 = vector.load %arg7[%c15, %c0_90] : memref<24x128xf32, #tpu.memory_space<vmem>>, vector<1x128xf32>
    %288 = vector.broadcast %287 : vector<1x128xf32> to vector<2x128xf32>
    %289 = arith.addf %286, %288 : vector<2x128xf32>
    %cst_91 = arith.constant 0.000000e+00 : f32
    %290 = vector.broadcast %cst_91 : f32 to vector<2x128xf32>
    %291 = arith.maximumf %289, %290 : vector<2x128xf32>
    %292 = arith.truncf %235 : vector<2x32xf32> to vector<2x32xbf16>
    %c256_92 = arith.constant 256 : index
    %c0_93 = arith.constant 0 : index
    %293 = vector.load %arg6[%c256_92, %c0_93] : memref<608x128xbf16, #tpu.memory_space<vmem>>, vector<32x128xbf16>
    %cst_94 = arith.constant dense<0.000000e+00> : vector<2x128xf32>
    %294 = tpu.matmul %292, %293, %cst_94 {dimension_numbers = #tpu.dot_dimension_numbers<[1], [0], [0], [1], [0, 0, 1, 1], [], []>} : vector<2x32xbf16>, vector<32x128xbf16>, vector<2x128xf32> -> vector<2x128xf32>
    %295 = arith.truncf %291 : vector<2x128xf32> to vector<2x128xbf16>
    %c288 = arith.constant 288 : index
    %c0_95 = arith.constant 0 : index
    %296 = vector.load %arg6[%c288, %c0_95] : memref<608x128xbf16, #tpu.memory_space<vmem>>, vector<128x128xbf16>
    %cst_96 = arith.constant dense<0.000000e+00> : vector<2x128xf32>
    %297 = tpu.matmul %295, %296, %cst_96 {dimension_numbers = #tpu.dot_dimension_numbers<[1], [0], [0], [1], [0, 0, 1, 1], [], []>} : vector<2x128xbf16>, vector<128x128xbf16>, vector<2x128xf32> -> vector<2x128xf32>
    %298 = arith.addf %294, %297 : vector<2x128xf32>
    %c16 = arith.constant 16 : index
    %c0_97 = arith.constant 0 : index
    %299 = vector.load %arg7[%c16, %c0_97] : memref<24x128xf32, #tpu.memory_space<vmem>>, vector<1x128xf32>
    %300 = vector.broadcast %299 : vector<1x128xf32> to vector<2x128xf32>
    %301 = arith.addf %298, %300 : vector<2x128xf32>
    %cst_98 = arith.constant 0.000000e+00 : f32
    %302 = vector.broadcast %cst_98 : f32 to vector<2x128xf32>
    %303 = arith.maximumf %301, %302 : vector<2x128xf32>
    %304 = arith.truncf %303 : vector<2x128xf32> to vector<2x128xbf16>
    %c416 = arith.constant 416 : index
    %c0_99 = arith.constant 0 : index
    %305 = vector.load %arg6[%c416, %c0_99] : memref<608x128xbf16, #tpu.memory_space<vmem>>, vector<128x128xbf16>
    %cst_100 = arith.constant dense<0.000000e+00> : vector<2x128xf32>
    %306 = tpu.matmul %304, %305, %cst_100 {dimension_numbers = #tpu.dot_dimension_numbers<[1], [0], [0], [1], [0, 0, 1, 1], [], []>} : vector<2x128xbf16>, vector<128x128xbf16>, vector<2x128xf32> -> vector<2x128xf32>
    %c17 = arith.constant 17 : index
    %c0_101 = arith.constant 0 : index
    %307 = vector.load %arg7[%c17, %c0_101] : memref<24x128xf32, #tpu.memory_space<vmem>>, vector<1x128xf32>
    %308 = vector.broadcast %307 : vector<1x128xf32> to vector<2x128xf32>
    %309 = arith.addf %306, %308 : vector<2x128xf32>
    %c0_102 = arith.constant 0 : index
    %c0_103 = arith.constant 0 : index
    %310 = vector.load %arg8[%c0_102, %c0_103] : memref<2x128xf32, #tpu.memory_space<vmem>>, vector<2x128xf32>
    tpu.vector_store %arg8[%c0_102, %c0_103], %309 {strides = array<i32>} : memref<2x128xf32, #tpu.memory_space<vmem>>, vector<2x128xf32>,
    return
  }
}

</mosaic_0001>

<bundles_post_ra>
// kernel: forward.1
= control target key start
LH: loop header
LB: loop body
LE: loop exit
PB: predicated region body
PF: predicated region fallthrough
CT: control target
= control target key end

     0   :  { %13 = vsyncpa [#allocation3], 0  ;;  %s4415_s0 = inlined_call_operand.vmem [shape: s32[16,1], index: 0, kind: input, shape index: {}]   ;;  %s4416_s1 = inlined_call_operand.vmem [shape: s32[2,8], index: 1, kind: input, shape index: {}]   ;;  %s4417_s2 = inlined_call_operand.vmem [shape: f32[2,16], index: 2, kind: input, shape index: {}]   ;;  %s4418_s3 = inlined_call_operand.vmem [shape: bf16[136,32], index: 3, kind: input, shape index: {}]   ;;  %s4419_s4 = inlined_call_operand.vmem [shape: bf16[32,768], index: 4, kind: input, shape index: {}]   ;;  %s4420_s5 = inlined_call_operand.hbm [shape: bf16[16,2048], index: 5, kind: input, shape index: {}]   ;;  %s4421_s6 = inlined_call_operand.hbm [shape: bf16[608,128], index: 6, kind: input, shape index: {}]   ;;  %s4422_s7 = inlined_call_operand.vmem [shape: f32[24,128], index: 7, kind: input, shape index: {}]   ;;  %s4423_s8 = inlined_call_operand.hbm [shape: f32[2,128], index: 8, kind: output, shape index: {}]  }
   0x1   :  { %14 = vsyncpa [#allocation6], 0 }
   0x2   :  { %15 = vsyncpa [#allocation4], 0  ;;  %s3854_s27 = smov [#allocation2]  }
   0x3   :  { %s31_s28 = sshll.u32 %s3854_s27, 4  ;;  %s32_s28 = int_to_ptr.vmem [resolvable:$true] %s31_s28 }
   0x4   :  { %s3796_s29 = scalar_lea.vmem %s32_s28, 2048  ;;  %p3801_p1 = scmp.lt.s32.totalorder %s32_s28, %s32_s28 }
   0x5   :  { %p3797_p0 = scmp.ne.s32.totalorder %s32_s28, %s3796_s29  ;;  %p3802_p2 = scmp.lt.s32.totalorder %s3796_s29, %s3796_s29 }
   0x7   :  { %p3803_p3 = por %p3802_p2, %p3801_p1 }
   0x9   :  { %p3804_p4 = pnand %p3803_p3, %p3797_p0 }
   0xb   :  { %3807 = shalt.err (!%p3804_p4)
}
   0xc   :  { %s3855_s30 = smov 1024   ;;  %s3856_s9 = smov 64  }
   0xd   :  { %37 = dma.hbm_to_vmem [thread:$0]  %s4420_s5, 2048, %s32_s28, [#allocation3], %s3855_s30, %s3855_s30, %s3856_s9  }
   0xe   :  { %s3857_s12 = smov [#allocation5]  }
   0xf   :  { %s43_s13 = sshll.u32 %s3857_s12, 4  ;;  %s44_s13 = int_to_ptr.vmem [resolvable:$true] %s43_s13 }
  0x10   :  { %s3816_s14 = scalar_lea.vmem %s44_s13, 4864  ;;  %p3821_p6 = scmp.lt.s32.totalorder %s44_s13, %s44_s13 }
  0x11   :  { %p3817_p5 = scmp.ne.s32.totalorder %s44_s13, %s3816_s14  ;;  %p3822_p7 = scmp.lt.s32.totalorder %s3816_s14, %s3816_s14 }
  0x13   :  { %p3823_p8 = por %p3822_p7, %p3821_p6 }
  0x15   :  { %p3824_p9 = pnand %p3823_p8, %p3817_p5 }
  0x17   :  { %3827 = shalt.err (!%p3824_p9)
}
  0x18   :  { %s3858_s15 = smov 4  }
  0x19   :  { %49 = dma.hbm_to_vmem [thread:$0]  %s4421_s6, 4864, %s44_s13, [#allocation6], %s3856_s9, %s3856_s9, %s3858_s15  }
  0x1a   :  { %3848 = dma.done.wait [#allocation3], 2048  }
  0x1b   :  { %3849 = vsyncadd [#allocation3], 4294965248 }
  0x1c   :  { %3850 = dma.done.wait [#allocation6], 4864  }
  0x1d   :  { %3851 = vsyncadd [#allocation6], 4294962432  ;;  %v3859_v0 = vmov 0   ;;  %v3860_v1 = vmov 0.0   ;;  %v59_v2 = vld [vmem:[%s4415_s0] sm:$0xff]  ;;  %v3680_v3 = vld [vmem:[%s4418_s3 + $0x38] sm:$0xff]   ;;  %v61_v12 = vlaneseq }
  0x1e   :  { %3664 = vset.pattern.permute.xlu0 %v3859_v0  ;;  %3399 = vmatprep.subr.bf16.mxu0 %v3860_v1  ;;  %v60_v4 = vld [vmem:[%s4415_s0 + $0x8] sm:$0xff]  ;;  %vm3861_vm0 = vmmov 0   ;;  %v3681_v5 = vld [vmem:[%s4418_s3 + $0x30] sm:$0xff]   ;;  %v3683_v7 = vld [vmem:[%s4418_s3 + $0x20] sm:$0xff]   ;;  %v3862_v16 = vmov 1.0|1.0  }
  0x1f   :  { %3419 = vmatprep.subr.bf16.mxu1 %v3860_v1  ;;  %64 = vperm.xlu0 %3664, %v59_v2   ;;  %v3682_v6 = vld [vmem:[%s4418_s3 + $0x28] sm:$0xff]   ;;  %v3684_v8 = vld [vmem:[%s4418_s3 + $0x18] sm:$0xff]   ;;  %v3685_v9 = vld [vmem:[%s4418_s3 + $0x10] sm:$0xff]   ;;  %v62_v14 = vand.u32 127, %v61_v12  ;;  %vm185_vm4 = vcmask 261120   ;;  %vm452_vm5 = vcmask 64512  }
  0x20   :  { %3415 = vmatprep.mubr.msk.bf16.mxu0 %vm3861_vm0, %v3860_v1  ;;  %3423 = vmatprep.mubr.msk.bf16.mxu1 %vm3861_vm0, %v3860_v1  ;;  %v3686_v10 = vld [vmem:[%s4418_s3 + $0x8] sm:$0xff]   ;;  %v3687_v11 = vld [vmem:[%s4418_s3] sm:$0xff]   ;;  %v3692_v58 = vld [vmem:[%s4419_s4 + $0x38] ss:$24 sps:$4 sm:$0xff]   ;;  %s3863_s11 = smov 120   ;;  %s3866_s14 = smov 104  }
  0x21   :  { %3400 = vmatpush3.bf16.msra.mxu0 %v3680_v3  ;;  %v179_v17 = vld [vmem:[%s4418_s3 + $0x40] sm:$0xf]  ;;  %v3688_v37 = vld [vmem:[%s4419_s4 + $0x30] ss:$24 sps:$4 sm:$0xff]   ;;  %v3690_v55 = vld [vmem:[%s4419_s4 + $0x34] ss:$24 sps:$4 sm:$0xff]  }
  0x22   :  { %3401 = vmatprep.subr.bf16.mxu0 %v3860_v1  ;;  %v180_v18 = vunpack.c.l.bf16 %v179_v17  ;;  %3420 = vmatpush3.bf16.msra.mxu1 %v3688_v37  ;;  %v3689_v38 = vld [vmem:[%s4419_s4] ss:$24 sps:$4 sm:$0xff]   ;;  %v3691_v57 = vld [vmem:[%s4419_s4 + $0x4] ss:$24 sps:$4 sm:$0xff]   ;;  %s3867_s3 = smov 8   ;;  %s3868_s15 = smov 16  }
  0x23   :  { %67 = vperm.xlu0 %3664, %v60_v4   ;;  %3421 = vmatprep.subr.bf16.mxu1 %v3860_v1  ;;  %v3171_v47 = vld [vmem:[%s4422_s7] ss:$0 sm:$0xff]  ;;  %v3172_v51 = vld [vmem:[%s4422_s7 + $0x1] ss:$0 sm:$0xff]  ;;  %v3177_v2 = vld [vmem:[%s4422_s7 + $0x7] ss:$0 sm:$0xff] }
  0x24   :  { %v3693_v59 = vld [vmem:[%s4419_s4 + $0x8] ss:$24 sps:$4 sm:$0xff]   ;;  %v3173_v4 = vld [vmem:[%s4422_s7 + $0x6] ss:$0 sm:$0xff]  ;;  %s3869_s19 = smov 24   ;;  %vm1791_vm6 = vcmask 130048  }
  0x25   :  { %3402 = vmatpush3.bf16.msra.mxu0 %v3681_v5  ;;  %vm1794_vm7 = vcmask 195584   ;;  %vm2027_vm8 = vcmask 523264   ;;  %vm2130_vm9 = vcmask 1041409   ;;  %s3870_s0 = smov [#allocation7]  }
  0x26   :  { %3403 = vmatprep.subr.bf16.mxu0 %v3860_v1  ;;  %3422 = vmatpush3.bf16.msra.mxu1 %v3689_v38  ;;  %s3151_s26 = sshll.u32 %s3870_s0, 4  ;;  %s3152_s26 = int_to_ptr.vmem [resolvable:$true] %s3151_s26 }
  0x27   :  { %3427 = vmatprep.subr.bf16.mxu1 %v3860_v1  ;;  %s3828_s27 = scalar_lea.vmem %s3152_s26, 32  ;;  %p3833_p11 = scmp.lt.s32.totalorder %s3152_s26, %s3152_s26 }
  0x28   :  { %p3829_p10 = scmp.ne.s32.totalorder %s3152_s26, %s3828_s27  ;;  %p3834_p12 = scmp.lt.s32.totalorder %s3828_s27, %s3828_s27 }
  0x29   :  { %3404 = vmatpush3.bf16.msra.mxu0 %v3682_v6 }
  0x2a   :  { %3405 = vmatprep.subr.bf16.mxu0 %v3860_v1  ;;  %p3835_p13 = por %p3834_p12, %p3833_p11 }
  0x2c   :  { %p3836_p0 = pnand %p3835_p13, %p3829_p10 }
  0x2d   :  { %3406 = vmatpush3.bf16.msra.mxu0 %v3683_v7 }
  0x2e   :  { %3407 = vmatprep.subr.bf16.mxu0 %v3860_v1 }
  0x31   :  { %3408 = vmatpush3.bf16.msra.mxu0 %v3684_v8 }
  0x32   :  { %3409 = vmatprep.subr.bf16.mxu0 %v3860_v1 }
  0x35   :  { %3410 = vmatpush3.bf16.msra.mxu0 %v3685_v9 }
  0x36   :  { %3411 = vmatprep.subr.bf16.mxu0 %v3860_v1 }
  0x39   :  { %3412 = vmatpush3.bf16.msra.mxu0 %v3686_v10 }
  0x3a   :  { %3413 = vmatprep.subr.bf16.mxu0 %v3860_v1 }
  0x3d   :  { %3414 = vmatpush3.bf16.msra.mxu0 %v3687_v11  ;;  %v3181_v11 = vld [vmem:[%s4422_s7 + $0x8] ss:$0 sm:$0xff] }
  0x3e   :  { %3453 = vmatprep.subr.mxu0 %v3860_v1 }
  0x9a   :  { %v65_v13 = vpop.permute.xlu0 %64 }
  0x9b   :  { %vm69_vm1 = vcmp.eq.s32.totalorder %v62_v14, %v65_v13 }
  0x9e   :  { %v68_v15 = vpop.permute.xlu0 %67 }
  0x9f   :  { %vm70_vm2 = vcmp.eq.s32.totalorder %v62_v14, %v68_v15 }
  0xa0   :  { %vm3169_vm3 = vmpackc.low %vm70_vm2, %vm69_vm1 }
  0xa1   :  { %3416 = vmatmul.mubr.msk.bf16.vlgmr.msra.gmra.mxu0 %vm3169_vm3, %v3862_v16 }
  0xa2   :  { %3455 = vmatprep.mubr.msk.f32.mxu0 %vm3861_vm0, %v3860_v1 }
 0x161   :  { %v172_v19 = vpop.f32.mrf.mxu0 }
 0x162   :  { %v181_v20 = vadd.f32 %v180_v18, %v172_v19 }
 0x163   :  { %v3417_v21 = vpop.f32.mrf.mxu0 }
 0x164   :  { %v186_v22 = vsel %vm185_vm4, %v181_v20, 0.0  ;;  %v3864_v21 = vmov 1966171168  }
 0x165   :  { %187 = vadd.xlane.f32.xlu1 %v186_v22  ;;  %v175_v23 = vpop.f32.mrf.mxu0  ;;  %v421_v22 = vunpack.c.l.s4 %v3864_v21 }
 0x166   :  { %v182_v24 = vadd.f32 %v180_v18, %v175_v23 }
 0x167   :  { %v3418_v25 = vpop.f32.mrf.mxu0 }
 0x168   :  { %v189_v26 = vsel %vm185_vm4, %v182_v24, 0.0  ;;  %v424_v25 = vshrl.u32 %v61_v12, 7 }
 0x169   :  { %190 = vadd.xlane.f32.xlu1 %v189_v26 }
 0x1ee   :  { %v188_v27 = vpop.xlane.xlu1 %187 }
 0x1ef   :  { %v193_v28 = vmul.f32 0.03125, %v188_v27 }
 0x1f1   :  { %v195_v29 = vsub.f32 %v181_v20, %v193_v28  ;;  %v415_v20 = vld [vmem:[%s4416_s1] sm:$0x3]  ;;  %s3865_s1 = smov 112  }
 0x1f2   :  { %v191_v30 = vpop.xlane.xlu1 %190  ;;  %v416_v23 = vcvt.s32.f32 %v415_v20 }
 0x1f3   :  { %v194_v31 = vmul.f32 0.03125, %v191_v30  ;;  %v197_v32 = vmul.f32 %v195_v29, %v195_v29  ;;  %v444_v30 = vsub.s32 0, %v424_v25 }
 0x1f4   :  { %v3185_v26 = vadd.f32 -1.0, %v416_v23 }
 0x1f5   :  { %v196_v33 = vsub.f32 %v182_v24, %v194_v31  ;;  %v199_v34 = vsel %vm185_vm4, %v197_v32, 0.0  ;;  %v422_v24 = vunpack.c.0.s8 %v421_v22 }
 0x1f6   :  { %200 = vadd.xlane.f32.xlu0 %v199_v34  ;;  %v418_v28 = vmul.f32 1e+09, %v3185_v26 }
 0x1f7   :  { %v198_v35 = vmul.f32 %v196_v33, %v196_v33  ;;  %v425_v27 = vsub.s32 %v422_v24, %v424_v25 }
 0x1f9   :  { %v202_v36 = vsel %vm185_vm4, %v198_v35, 0.0 }
 0x1fa   :  { %203 = vadd.xlane.f32.xlu1 %v202_v36 }
 0x27f   :  { %v201_v39 = vpop.xlane.xlu0 %200 }
 0x280   :  { %v205_v40 = vmul.f32 0.03125, %v201_v39 }
 0x282   :  { %v207_v41 = vadd.f32 1e-05, %v205_v40 }
 0x283   :  { %v204_v42 = vpop.xlane.xlu1 %203 }
 0x284   :  { %3738 = vrsqrt.f32 %v207_v41  ;;  %v206_v43 = vmul.f32 0.03125, %v204_v42 }
 0x286   :  { %v208_v44 = vadd.f32 1e-05, %v206_v43 }
 0x288   :  { %3740 = vrsqrt.f32 %v208_v44 }
 0x291   :  { %v3739_v45 = vpop.eup %3738 }
 0x292   :  { %v211_v46 = vmul.f32 %v3739_v45, %v195_v29  ;;  %v426_v29 = vrot.slane %v418_v28, %v425_v27 }
 0x294   :  { %v217_v50 = vmul.f32 %v3171_v47, %v211_v46  ;;  %v434_v31 = vrot.slane %v426_v29, %v425_v27  ;;  %v427_v32 = vcombine.high %v426_v29, %v426_v29 }
 0x295   :  { %v3741_v48 = vpop.eup %3740 }
 0x296   :  { %v212_v49 = vmul.f32 %v3741_v48, %v196_v33  ;;  %v3991_v53 = vadd.f32 %v3172_v51, %v217_v50  ;;  %v4067_v33 = vrot.slane %v434_v31, %v444_v30  ;;  %v441_v34 = vrot.slane %v427_v32, %v425_v27 }
 0x298   :  { %v218_v52 = vmul.f32 %v3171_v47, %v212_v49  ;;  %v4070_v37 = vrot.slane %v441_v34, %v444_v30 }
 0x29a   :  { %v3993_v54 = vadd.f32 %v3172_v51, %v218_v52 }
 0x29c   :  { %v225_v56 = vpack.c.bf16 %v3993_v54, %v3991_v53 }
 0x29e   :  { %3424 = vmatmul.mubr.msk.bf16.vlgmr.msra.gmra.mxu1 %vm185_vm4, %v225_v56 }
 0x29f   :  { %3428 = vmatpush3.bf16.msra.mxu1 %v3690_v55  ;;  %3431 = vmatprep.mubr.msk.bf16.mxu1 %vm3861_vm0, %v3860_v1 }
 0x2a0   :  { %3429 = vmatprep.subr.bf16.mxu1 %v3860_v1 }
 0x2a3   :  { %3430 = vmatpush3.bf16.msra.mxu1 %v3691_v57 }
 0x2a4   :  { %3435 = vmatprep.subr.bf16.mxu1 %v3860_v1 }
 0x2a6   :  { %3432 = vmatmul.mubr.msk.bf16.vlgmr.msra.gmra.mxu1 %vm185_vm4, %v225_v56 }
 0x2a7   :  { %3436 = vmatpush3.bf16.msra.mxu1 %v3692_v58  ;;  %3439 = vmatprep.mubr.msk.bf16.mxu1 %vm3861_vm0, %v3860_v1 }
 0x2a8   :  { %3437 = vmatprep.subr.bf16.mxu1 %v3860_v1 }
 0x2ab   :  { %3438 = vmatpush3.bf16.msra.mxu1 %v3693_v59 }
 0x2ac   :  { %3443 = vmatprep.subr.mxu1 %v3860_v1 }
 0x2ae   :  { %3440 = vmatmul.mubr.msk.bf16.vlgmr.msra.gmra.mxu1 %vm185_vm4, %v225_v56 }
 0x2af   :  { %3445 = vmatprep.mubr.msk.f32.mxu1 %vm3861_vm0, %v3860_v1 }
 0x35e   :  { %v284_v60 = vpop.f32.mrf.mxu1 }
 0x35f   :  { %v4032_v7 = vadd.f32 %v3173_v4, %v284_v60 }
 0x360   :  { %v3425_v61 = vpop.f32.mrf.mxu1 }
 0x362   :  { %v287_v62 = vpop.f32.mrf.mxu1 }
 0x363   :  { %v4046_v13 = vadd.f32 %v3173_v4, %v287_v62 }
 0x364   :  { %v3426_v63 = vpop.f32.mrf.mxu1 }
 0x366   :  { %v346_v3 = vpop.f32.mrf.mxu1 }
 0x367   :  { %v4028_v5 = vadd.f32 %v3177_v2, %v346_v3 }
 0x368   :  { %v3433_v6 = vpop.f32.mrf.mxu1 }
 0x369   :  { %3444 = vmatpush3.xpose.msk.msra.mxu1 %vm452_vm5, %v4028_v5 }
 0x36a   :  { %v349_v8 = vpop.f32.mrf.mxu1  ;;  %3448 = vmatprep.subr.mxu1 %v3860_v1 }
 0x36b   :  { %v4035_v9 = vadd.f32 %v3177_v2, %v349_v8 }
 0x36c   :  { %v3434_v10 = vpop.f32.mrf.mxu1  ;;  %3446 = vmatmul.mubr.msk.f32.vlgmr.msra.gmra.mxu1 %vm452_vm5, %v4032_v7 }
 0x36d   :  { %853 = vrot.lane.b32.xlu0 %v4035_v9, %s3863_s11  ;;  %3449 = vmatpush3.xpose.msk.msra.mxu1 %vm452_vm5, %v4035_v9 }
 0x36e   :  { %v408_v14 = vpop.f32.mrf.mxu1  ;;  %3450 = vmatprep.mubr.msk.f32.mxu1 %vm3861_vm0, %v3860_v1  ;;  %3458 = vmatprep.subr.mxu1 %v3860_v1 }
 0x36f   :  { %v4051_v15 = vadd.f32 %v3181_v11, %v408_v14 }
 0x370   :  { %v3441_v16 = vpop.f32.mrf.mxu1  ;;  %3451 = vmatmul.mubr.msk.f32.vlgmr.msra.gmra.mxu1 %vm452_vm5, %v4046_v13 }
 0x371   :  { %3454 = vmatpush3.msra.mxu0 %v4051_v15  ;;  %3460 = vmatprep.mubr.msk.f32.mxu1 %vm3861_vm0, %v3860_v1 }
 0x372   :  { %v411_v17 = vpop.f32.mrf.mxu1  ;;  %3463 = vmatprep.subr.mxu0 %v3860_v1 }
 0x373   :  { %v4059_v18 = vadd.f32 %v3181_v11, %v411_v17 }
 0x374   :  { %v3442_v19 = vpop.f32.mrf.mxu1 }
 0x375   :  { %3459 = vmatpush3.msra.mxu1 %v4059_v18 }
 0x376   :  { %3468 = vmatprep.subr.mxu1 %v3860_v1 }
 0x3df   :  { %v854_v63 = vpop.permute.xlu0 %853 }
 0x42c   :  { %v525_v35 = vpop.f32.mrf.mxu1 }
 0x42d   :  { %v526_v36 = vadd.f32 %v525_v35, %v4067_v33 }
 0x42e   :  { %v3447_v38 = vpop.f32.mrf.mxu1 }
 0x42f   :  { %v605_v39 = vsel %vm452_vm5, %v526_v36, -inf }
 0x430   :  { %606 = vmax.xlane.f32.xlu1 %v605_v39  ;;  %v601_v12 = vpop.f32.mrf.mxu1 }
 0x431   :  { %v602_v40 = vadd.f32 %v601_v12, %v4070_v37 }
 0x432   :  { %v3452_v41 = vpop.f32.mrf.mxu1 }
 0x433   :  { %v608_v42 = vsel %vm452_vm5, %v602_v40, -inf }
 0x434   :  { %609 = vmax.xlane.f32.xlu1 %v608_v42 }
 0x445   :  { %775 = vrot.lane.b32.xlu1 %v4028_v5, %s3863_s11 }
 0x449   :  { %773 = vrot.lane.b32.xlu1 %v4032_v7, %s3863_s11 }
 0x4b9   :  { %v607_v43 = vpop.xlane.xlu1 %606 }
 0x4ba   :  { %v611_v44 = vsub.f32 %v526_v36, %v607_v43 }
 0x4bc   :  { %v613_v45 = vmul.f32 1.442695, %v611_v44 }
 0x4bd   :  { %v610_v46 = vpop.xlane.xlu1 %609 }
 0x4be   :  { %3742 = vpow2.f32 %v613_v45  ;;  %v612_v47 = vsub.f32 %v602_v40, %v610_v46 }
 0x4c0   :  { %v615_v48 = vmul.f32 1.442695, %v612_v47 }
 0x4c1   :  { %v776_v55 = vpop.permute.xlu1 %775 }
 0x4c2   :  { %3744 = vpow2.f32 %v615_v48 }
 0x4c5   :  { %v774_v56 = vpop.permute.xlu1 %773 }
 0x4cb   :  { %v3743_v49 = vpop.eup %3742 }
 0x4cc   :  { %v617_v50 = vsel %vm452_vm5, %v3743_v49, 0.0 }
 0x4cd   :  { %618 = vadd.xlane.f32.xlu1 %v617_v50 }
 0x4cf   :  { %v3745_v51 = vpop.eup %3744 }
 0x4d0   :  { %v620_v52 = vsel %vm452_vm5, %v3745_v51, 0.0 }
 0x4d1   :  { %621 = vadd.xlane.f32.xlu1 %v620_v52 }
 0x4e2   :  { %851 = vrot.lane.b32.xlu1 %v4046_v13, %s3863_s11 }
 0x556   :  { %v619_v57 = vpop.xlane.xlu1 %618 }
 0x557   :  { %3746 = vrcp.f32 %v619_v57 }
 0x55a   :  { %v622_v58 = vpop.xlane.xlu1 %621 }
 0x55b   :  { %3748 = vrcp.f32 %v622_v58 }
 0x55e   :  { %v852_v2 = vpop.permute.xlu1 %851 }
 0x564   :  { %v3747_v59 = vpop.eup %3746 }
 0x565   :  { %v625_v60 = vmul.f32 %v3747_v59, %v3743_v49 }
 0x567   :  { %3456 = vmatmul.mubr.msk.f32.vlgmr.msra.gmra.mxu0 %vm452_vm5, %v625_v60 }
 0x568   :  { %v3749_v61 = vpop.eup %3748  ;;  %3464 = vmatpush3.xpose.msk.msra.mxu0 %vm452_vm5, %v776_v55  ;;  %3465 = vmatprep.mubr.msk.f32.mxu0 %vm3861_vm0, %v3860_v1 }
 0x569   :  { %v626_v62 = vmul.f32 %v3749_v61, %v3745_v51  ;;  %3473 = vmatprep.subr.mxu0 %v3860_v1 }
 0x56b   :  { %3461 = vmatmul.mubr.msk.f32.vlgmr.msra.gmra.mxu1 %vm452_vm5, %v626_v62  ;;  %3466 = vmatmul.mubr.msk.f32.vlgmr.msra.gmra.mxu0 %vm452_vm5, %v774_v56 }
 0x56c   :  { %3469 = vmatpush3.xpose.msk.msra.mxu1 %vm452_vm5, %v854_v63  ;;  %3470 = vmatprep.mubr.msk.f32.mxu1 %vm3861_vm0, %v3860_v1 }
 0x56d   :  { %3478 = vmatprep.subr.mxu1 %v3860_v1  ;;  %3475 = vmatprep.mubr.msk.f32.mxu0 %vm3861_vm0, %v3860_v1 }
 0x56f   :  { %3471 = vmatmul.mubr.msk.f32.vlgmr.msra.gmra.mxu1 %vm452_vm5, %v852_v2 }
 0x570   :  { %3480 = vmatprep.mubr.msk.f32.mxu1 %vm3861_vm0, %v3860_v1 }
 0x627   :  { %v4099_v3 = vpop.f32.mrf.mxu0 }
 0x629   :  { %v3457_v4 = vpop.f32.mrf.mxu0 }
 0x62b   :  { %v4101_v6 = vpop.f32.mrf.mxu1  ;;  %v847_v8 = vpop.f32.mrf.mxu0 }
 0x62c   :  { %v848_v10 = vadd.f32 %v847_v8, %v4067_v33 }
 0x62d   :  { %v3462_v11 = vpop.f32.mrf.mxu1  ;;  %v3467_v14 = vpop.f32.mrf.mxu0 }
 0x62e   :  { %v929_v16 = vsel %vm452_vm5, %v848_v10, -inf }
 0x62f   :  { %v925_v17 = vpop.f32.mrf.mxu1  ;;  %930 = vmax.xlane.f32.xlu1 %v929_v16 }
 0x630   :  { %v926_v19 = vadd.f32 %v925_v17, %v4070_v37 }
 0x631   :  { %v3472_v20 = vpop.f32.mrf.mxu1 }
 0x632   :  { %v932_v21 = vsel %vm452_vm5, %v926_v19, -inf }
 0x633   :  { %933 = vmax.xlane.f32.xlu0 %v932_v21 }
 0x640   :  { %952 = vrot.lane.b32.xlu1 %v4051_v15, %s3863_s11 }
 0x6b8   :  { %v931_v22 = vpop.xlane.xlu1 %930 }
 0x6b9   :  { %v935_v23 = vsub.f32 %v848_v10, %v931_v22 }
 0x6bb   :  { %v937_v24 = vmul.f32 1.442695, %v935_v23 }
 0x6bc   :  { %v934_v25 = vpop.xlane.xlu0 %933  ;;  %v953_v26 = vpop.permute.xlu1 %952 }
 0x6bd   :  { %3750 = vpow2.f32 %v937_v24  ;;  %v936_v27 = vsub.f32 %v926_v19, %v934_v25  ;;  %3474 = vmatpush3.msra.mxu0 %v953_v26 }
 0x6be   :  { %3483 = vmatprep.subr.mxu0 %v3860_v1 }
 0x6bf   :  { %v939_v28 = vmul.f32 1.442695, %v936_v27 }
 0x6c1   :  { %3752 = vpow2.f32 %v939_v28 }
 0x6ca   :  { %v3751_v29 = vpop.eup %3750 }
 0x6cb   :  { %v941_v30 = vsel %vm452_vm5, %v3751_v29, 0.0 }
 0x6cc   :  { %942 = vadd.xlane.f32.xlu1 %v941_v30 }
 0x6ce   :  { %v3753_v31 = vpop.eup %3752 }
 0x6cf   :  { %v944_v32 = vsel %vm452_vm5, %v3753_v31, 0.0 }
 0x6d0   :  { %945 = vadd.xlane.f32.xlu0 %v944_v32 }
 0x6dd   :  { %1107 = vrot.lane.b32.xlu1 %v4028_v5, %s3865_s1 }
 0x6e1   :  { %1185 = vrot.lane.b32.xlu1 %v4035_v9, %s3865_s1 }
 0x6e5   :  { %1183 = vrot.lane.b32.xlu1 %v4046_v13, %s3865_s1 }
 0x6e6   :  { %1029 = vrot.lane.b32.xlu0 %v4059_v18, %s3863_s11 }
 0x6ea   :  { %1105 = vrot.lane.b32.xlu0 %v4032_v7, %s3865_s1 }
 0x755   :  { %v943_v34 = vpop.xlane.xlu1 %942 }
 0x756   :  { %3754 = vrcp.f32 %v943_v34 }
 0x759   :  { %v946_v35 = vpop.xlane.xlu0 %945  ;;  %v1108_v38 = vpop.permute.xlu1 %1107 }
 0x75a   :  { %3756 = vrcp.f32 %v946_v35 }
 0x75d   :  { %v1030_v36 = vpop.permute.xlu0 %1029  ;;  %v1186_v41 = vpop.permute.xlu1 %1185 }
 0x75e   :  { %3479 = vmatpush3.msra.mxu1 %v1030_v36 }
 0x75f   :  { %3488 = vmatprep.subr.mxu1 %v3860_v1 }
 0x761   :  { %v1106_v43 = vpop.permute.xlu0 %1105  ;;  %v1184_v44 = vpop.permute.xlu1 %1183 }
 0x763   :  { %v3755_v39 = vpop.eup %3754 }
 0x764   :  { %v949_v12 = vmul.f32 %v3755_v39, %v3751_v29 }
 0x766   :  { %3476 = vmatmul.mubr.msk.f32.vlgmr.msra.gmra.mxu0 %vm452_vm5, %v949_v12 }
 0x767   :  { %v3757_v40 = vpop.eup %3756  ;;  %3484 = vmatpush3.xpose.msk.msra.mxu0 %vm452_vm5, %v1108_v38  ;;  %3485 = vmatprep.mubr.msk.f32.mxu0 %vm3861_vm0, %v3860_v1 }
 0x768   :  { %v950_v42 = vmul.f32 %v3757_v40, %v3753_v31  ;;  %3493 = vmatprep.subr.mxu0 %v3860_v1 }
 0x76a   :  { %3481 = vmatmul.mubr.msk.f32.vlgmr.msra.gmra.mxu1 %vm452_vm5, %v950_v42  ;;  %3486 = vmatmul.mubr.msk.f32.vlgmr.msra.gmra.mxu0 %vm452_vm5, %v1106_v43 }
 0x76b   :  { %3489 = vmatpush3.xpose.msk.msra.mxu1 %vm452_vm5, %v1186_v41  ;;  %3490 = vmatprep.mubr.msk.f32.mxu1 %vm3861_vm0, %v3860_v1 }
 0x76c   :  { %3498 = vmatprep.subr.mxu1 %v3860_v1  ;;  %3495 = vmatprep.mubr.msk.f32.mxu0 %vm3861_vm0, %v3860_v1 }
 0x76e   :  { %3491 = vmatmul.mubr.msk.f32.vlgmr.msra.gmra.mxu1 %vm452_vm5, %v1184_v44 }
 0x76f   :  { %3500 = vmatprep.mubr.msk.f32.mxu1 %vm3861_vm0, %v3860_v1 }
 0x826   :  { %v4139_v45 = vpop.f32.mrf.mxu0 }
 0x828   :  { %v3477_v46 = vpop.f32.mrf.mxu0 }
 0x82a   :  { %v4141_v47 = vpop.f32.mrf.mxu1  ;;  %v1179_v48 = vpop.f32.mrf.mxu0 }
 0x82b   :  { %v3665_v49 = vpack.i.bf16 %v4141_v47, %v4139_v45  ;;  %v1180_v50 = vadd.f32 %v1179_v48, %v4067_v33 }
 0x82c   :  { %v3482_v51 = vpop.f32.mrf.mxu1  ;;  %v3487_v52 = vpop.f32.mrf.mxu0 }
 0x82d   :  { %v1261_v55 = vsel %vm452_vm5, %v1180_v50, -inf }
 0x82e   :  { %v1257_v56 = vpop.f32.mrf.mxu1  ;;  %1262 = vmax.xlane.f32.xlu0 %v1261_v55 }
 0x82f   :  { %v1258_v57 = vadd.f32 %v1257_v56, %v4070_v37  ;;  %v3695_v56 = vld [vmem:[%s4419_s4 + $0xc] ss:$24 sps:$4 sm:$0xff]  }
 0x830   :  { %v3492_v58 = vpop.f32.mrf.mxu1 }
 0x831   :  { %v1264_v59 = vsel %vm452_vm5, %v1258_v57, -inf }
 0x832   :  { %1265 = vmax.xlane.f32.xlu1 %v1264_v59 }
 0x843   :  { %1283 = vrot.lane.b32.xlu1 %v4051_v15, %s3865_s1 }
 0x847   :  { %1437 = vrot.lane.b32.xlu1 %v4028_v5, %s3866_s14 }
 0x84b   :  { %1515 = vrot.lane.b32.xlu1 %v4035_v9, %s3866_s14 }
 0x84f   :  { %1513 = vrot.lane.b32.xlu1 %v4046_v13, %s3866_s14 }
 0x8b7   :  { %v1263_v60 = vpop.xlane.xlu0 %1262 }
 0x8b8   :  { %v1267_v61 = vsub.f32 %v1180_v50, %v1263_v60 }
 0x8ba   :  { %v1269_v62 = vmul.f32 1.442695, %v1267_v61 }
 0x8bb   :  { %v1266_v63 = vpop.xlane.xlu1 %1265 }
 0x8bc   :  { %3758 = vpow2.f32 %v1269_v62  ;;  %v1268_v2 = vsub.f32 %v1258_v57, %v1266_v63 }
 0x8be   :  { %v1271_v4 = vmul.f32 1.442695, %v1268_v2 }
 0x8bf   :  { %v1284_v8 = vpop.permute.xlu1 %1283 }
 0x8c0   :  { %3760 = vpow2.f32 %v1271_v4  ;;  %3494 = vmatpush3.msra.mxu0 %v1284_v8 }
 0x8c1   :  { %3503 = vmatprep.subr.mxu0 %v3860_v1 }
 0x8c3   :  { %v1438_v17 = vpop.permute.xlu1 %1437 }
 0x8c7   :  { %v1516_v22 = vpop.permute.xlu1 %1515 }
 0x8c9   :  { %v3759_v10 = vpop.eup %3758 }
 0x8ca   :  { %v1273_v5 = vsel %vm452_vm5, %v3759_v10, 0.0 }
 0x8cb   :  { %1274 = vadd.xlane.f32.xlu0 %v1273_v5  ;;  %v1514_v24 = vpop.permute.xlu1 %1513 }
 0x8cd   :  { %v3761_v9 = vpop.eup %3760 }
 0x8ce   :  { %v1276_v11 = vsel %vm452_vm5, %v3761_v9, 0.0 }
 0x8cf   :  { %1277 = vadd.xlane.f32.xlu0 %v1276_v11 }
 0x8e5   :  { %1359 = vrot.lane.b32.xlu0 %v4059_v18, %s3865_s1 }
 0x8e9   :  { %1435 = vrot.lane.b32.xlu0 %v4032_v7, %s3866_s14 }
 0x954   :  { %v1275_v13 = vpop.xlane.xlu0 %1274 }
 0x955   :  { %3762 = vrcp.f32 %v1275_v13 }
 0x958   :  { %v1278_v14 = vpop.xlane.xlu0 %1277 }
 0x959   :  { %3764 = vrcp.f32 %v1278_v14 }
 0x95c   :  { %v1360_v16 = vpop.permute.xlu0 %1359 }
 0x95d   :  { %3499 = vmatpush3.msra.mxu1 %v1360_v16 }
 0x95e   :  { %3508 = vmatprep.subr.mxu1 %v3860_v1 }
 0x960   :  { %v1436_v23 = vpop.permute.xlu0 %1435 }
 0x962   :  { %v3763_v19 = vpop.eup %3762 }
 0x963   :  { %v1281_v20 = vmul.f32 %v3763_v19, %v3759_v10 }
 0x965   :  { %3496 = vmatmul.mubr.msk.f32.vlgmr.msra.gmra.mxu0 %vm452_vm5, %v1281_v20 }
 0x966   :  { %v3765_v21 = vpop.eup %3764  ;;  %3504 = vmatpush3.xpose.msk.msra.mxu0 %vm452_vm5, %v1438_v17  ;;  %3505 = vmatprep.mubr.msk.f32.mxu0 %vm3861_vm0, %v3860_v1 }
 0x967   :  { %v1282_v7 = vmul.f32 %v3765_v21, %v3761_v9  ;;  %3513 = vmatprep.subr.mxu0 %v3860_v1 }
 0x969   :  { %3501 = vmatmul.mubr.msk.f32.vlgmr.msra.gmra.mxu1 %vm452_vm5, %v1282_v7  ;;  %3506 = vmatmul.mubr.msk.f32.vlgmr.msra.gmra.mxu0 %vm452_vm5, %v1436_v23 }
 0x96a   :  { %3509 = vmatpush3.xpose.msk.msra.mxu1 %vm452_vm5, %v1516_v22  ;;  %3510 = vmatprep.mubr.msk.f32.mxu1 %vm3861_vm0, %v3860_v1 }
 0x96b   :  { %3518 = vmatprep.subr.mxu1 %v3860_v1  ;;  %3515 = vmatprep.mubr.msk.f32.mxu0 %vm3861_vm0, %v3860_v1 }
 0x96d   :  { %3511 = vmatmul.mubr.msk.f32.vlgmr.msra.gmra.mxu1 %vm452_vm5, %v1514_v24 }
 0x96e   :  { %3520 = vmatprep.mubr.msk.f32.mxu1 %vm3861_vm0, %v3860_v1 }
 0xa25   :  { %v1355_v25 = vpop.f32.mrf.mxu0 }
 0xa27   :  { %v3497_v26 = vpop.f32.mrf.mxu0 }
 0xa29   :  { %v1431_v27 = vpop.f32.mrf.mxu1  ;;  %v1509_v28 = vpop.f32.mrf.mxu0 }
 0xa2a   :  { %v1510_v29 = vadd.f32 %v1509_v28, %v4067_v33  ;;  %v3670_v33 = vpack.i.bf16 %v1431_v27, %v1355_v25 }
 0xa2b   :  { %v3502_v30 = vpop.f32.mrf.mxu1  ;;  %v3507_v31 = vpop.f32.mrf.mxu0 }
 0xa2c   :  { %v1591_v32 = vsel %vm452_vm5, %v1510_v29, -inf }
 0xa2d   :  { %v1587_v34 = vpop.f32.mrf.mxu1  ;;  %1592 = vmax.xlane.f32.xlu0 %v1591_v32 }
 0xa2e   :  { %v1588_v35 = vadd.f32 %v1587_v34, %v4070_v37 }
 0xa2f   :  { %v3512_v36 = vpop.f32.mrf.mxu1 }
 0xa30   :  { %v1594_v38 = vsel %vm452_vm5, %v1588_v35, -inf }
 0xa31   :  { %1595 = vmax.xlane.f32.xlu1 %v1594_v38 }
 0xa42   :  { %1613 = vrot.lane.b32.xlu1 %v4051_v15, %s3866_s14 }
 0xa46   :  { %3666 = vrot.lane.b32.xlu1 %v3665_v49, %s3867_s3 }
 0xa4a   :  { %3671 = vrot.lane.b32.xlu1 %v3670_v33, %s3868_s15 }
 0xab6   :  { %v1593_v39 = vpop.xlane.xlu0 %1592 }
 0xab7   :  { %v1597_v12 = vsub.f32 %v1510_v29, %v1593_v39 }
 0xab9   :  { %v1599_v40 = vmul.f32 1.442695, %v1597_v12  ;;  %v3697_v12 = vld [vmem:[%s4419_s4 + $0x10] ss:$24 sps:$4 sm:$0xff]  }
 0xaba   :  { %v1596_v41 = vpop.xlane.xlu1 %1595 }
 0xabb   :  { %3766 = vpow2.f32 %v1599_v40  ;;  %v1598_v37 = vsub.f32 %v1588_v35, %v1596_v41 }
 0xabd   :  { %v1601_v42 = vmul.f32 1.442695, %v1598_v37 }
 0xabe   :  { %v1614_v43 = vpop.permute.xlu1 %1613 }
 0xabf   :  { %3768 = vpow2.f32 %v1601_v42  ;;  %3514 = vmatpush3.msra.mxu0 %v1614_v43 }
 0xac0   :  { %3539 = vmatprep.subr.bf16.mxu0 %v3860_v1 }
 0xac2   :  { %v3667_v62 = vpop.permute.xlu1 %3666 }
 0xac3   :  { %v3669_v2 = vunpack.i.h.bf16 %v3667_v62  ;;  %v3668_v4 = vunpack.i.l.bf16 %v3667_v62 }
 0xac5   :  { %v1790_v9 = vsel %vm452_vm5, %v4101_v6, %v3669_v2  ;;  %v1789_v11 = vsel %vm452_vm5, %v4099_v3, %v3668_v4  ;;  %v3210_v6 = vld [vmem:[%s4422_s7 + $0x9] ss:$0 sm:$0xff] }
 0xac6   :  { %v3672_v63 = vpop.permute.xlu1 %3671 }
 0xac7   :  { %v3674_v8 = vunpack.i.h.bf16 %v3672_v63  ;;  %v3673_v10 = vunpack.i.l.bf16 %v3672_v63 }
 0xac8   :  { %v3767_v15 = vpop.eup %3766 }
 0xac9   :  { %v1603_v44 = vsel %vm452_vm5, %v3767_v15, 0.0  ;;  %v1793_v16 = vsel %vm1791_vm6, %v1790_v9, %v3674_v8  ;;  %v1792_v17 = vsel %vm1791_vm6, %v1789_v11, %v3673_v10 }
 0xaca   :  { %1604 = vadd.xlane.f32.xlu0 %v1603_v44 }
 0xacc   :  { %v3769_v45 = vpop.eup %3768 }
 0xacd   :  { %v1606_v46 = vsel %vm452_vm5, %v3769_v45, 0.0 }
 0xace   :  { %1607 = vadd.xlane.f32.xlu0 %v1606_v46  ;;  %v3214_v46 = vld [vmem:[%s4422_s7 + $0x2] ss:$0 sm:$0xff] }
 0xae4   :  { %1689 = vrot.lane.b32.xlu0 %v4059_v18, %s3866_s14  ;;  %v3694_v18 = vld [vmem:[%s4419_s4 + $0x3c] ss:$24 sps:$4 sm:$0xff]  }
 0xb53   :  { %v1605_v47 = vpop.xlane.xlu0 %1604 }
 0xb54   :  { %3770 = vrcp.f32 %v1605_v47 }
 0xb57   :  { %v1608_v48 = vpop.xlane.xlu0 %1607 }
 0xb58   :  { %3772 = vrcp.f32 %v1608_v48 }
 0xb5b   :  { %v1690_v49 = vpop.permute.xlu0 %1689 }
 0xb5c   :  { %3519 = vmatpush3.msra.mxu1 %v1690_v49 }
 0xb5d   :  { %3523 = vmatprep.subr.bf16.mxu1 %v3860_v1 }
 0xb61   :  { %v3771_v50 = vpop.eup %3770 }
 0xb62   :  { %v1611_v51 = vmul.f32 %v3771_v50, %v3767_v15  ;;  %v3215_v50 = vld [vmem:[%s4422_s7 + $0x3] ss:$0 sm:$0xff] }
 0xb64   :  { %3516 = vmatmul.mubr.msk.f32.vlgmr.msra.gmra.mxu0 %vm452_vm5, %v1611_v51 }
 0xb65   :  { %v3773_v52 = vpop.eup %3772  ;;  %3547 = vmatprep.mubr.msk.bf16.mxu0 %vm3861_vm0, %v3860_v1 }
 0xb66   :  { %v1612_v55 = vmul.f32 %v3773_v52, %v3769_v45 }
 0xb68   :  { %3521 = vmatmul.mubr.msk.f32.vlgmr.msra.gmra.mxu1 %vm452_vm5, %v1612_v55 }
 0xb69   :  { %3527 = vmatprep.mubr.msk.bf16.mxu1 %vm3861_vm0, %v3860_v1  ;;  %3524 = vmatpush3.bf16.msra.mxu1 %v3694_v18 }
 0xb6a   :  { %3525 = vmatprep.subr.bf16.mxu1 %v3860_v1 }
 0xb6d   :  { %3526 = vmatpush3.bf16.msra.mxu1 %v3695_v56  ;;  %v3698_v56 = vld [vmem:[#allocation5 + $0x128] sm:$0xff]  }
 0xb6e   :  { %3531 = vmatprep.subr.bf16.mxu1 %v3860_v1  ;;  %3540 = vmatpush3.bf16.msra.mxu0 %v3698_v56 }
 0xb6f   :  { %3541 = vmatprep.subr.bf16.mxu0 %v3860_v1 }
 0xc24   :  { %v1685_v57 = vpop.f32.mrf.mxu0 }
 0xc26   :  { %v3517_v58 = vpop.f32.mrf.mxu0 }
 0xc27   :  { %v3700_v58 = vld [vmem:[#allocation5 + $0x118] sm:$0xff]  }
 0xc28   :  { %v1761_v59 = vpop.f32.mrf.mxu1 }
 0xc29   :  { %v3675_v60 = vpack.i.bf16 %v1761_v59, %v1685_v57  ;;  %v3699_v57 = vld [vmem:[#allocation5 + $0x120] sm:$0xff]   ;;  %v3701_v59 = vld [vmem:[#allocation5 + $0x110] sm:$0xff]  }
 0xc2a   :  { %v3522_v61 = vpop.f32.mrf.mxu1  ;;  %3542 = vmatpush3.bf16.msra.mxu0 %v3699_v57  ;;  %v2194_v57 = vld [vmem:[#allocation2 + $0x18] sm:$0xff] }
 0xc2b   :  { %3676 = vrot.lane.b32.xlu0 %v3675_v60, %s3869_s19  ;;  %3543 = vmatprep.subr.bf16.mxu0 %v3860_v1  ;;  %v3216_v60 = vld [vmem:[%s4422_s7 + $0xa] ss:$0 sm:$0xff] }
 0xc2e   :  { %3544 = vmatpush3.bf16.msra.mxu0 %v3700_v58  ;;  %v2202_v58 = vld [vmem:[#allocation2 + $0x58] sm:$0xff] }
 0xc2f   :  { %3545 = vmatprep.subr.bf16.mxu0 %v3860_v1 }
 0xc32   :  { %3546 = vmatpush3.bf16.msra.mxu0 %v3701_v59  ;;  %v3238_v59 = vcombine.low %v2194_v57, %v2202_v58 }
 0xc9d   :  { %v3677_v5 = vpop.permute.xlu0 %3676 }
 0xc9e   :  { %v3679_v13 = vunpack.i.h.bf16 %v3677_v5  ;;  %v3678_v14 = vunpack.i.l.bf16 %v3677_v5 }
 0xca0   :  { %v1796_v19 = vsel %vm1794_vm7, %v1793_v16, %v3679_v13  ;;  %v1795_v20 = vsel %vm1794_vm7, %v1792_v17, %v3678_v14 }
 0xca1   :  { %v1797_v21 = vpack.c.bf16 %v1796_v19, %v1795_v20 }
 0xca3   :  { %3528 = vmatmul.mubr.msk.bf16.vlgmr.msra.gmra.mxu1 %vm185_vm4, %v1797_v21 }
 0xca4   :  { %3535 = vmatprep.mubr.msk.bf16.mxu1 %vm3861_vm0, %v3860_v1 }
 0xd63   :  { %v1856_v22 = vpop.f32.mrf.mxu1 }
 0xd64   :  { %v1857_v3 = vadd.f32 %v3210_v6, %v1856_v22 }
 0xd65   :  { %v3529_v7 = vpop.f32.mrf.mxu1 }
 0xd66   :  { %v1863_v23 = vadd.f32 %v1857_v3, %v3991_v53 }
 0xd67   :  { %v1859_v24 = vpop.f32.mrf.mxu1 }
 0xd68   :  { %v1860_v25 = vadd.f32 %v3210_v6, %v1859_v24  ;;  %v1867_v26 = vsel %vm185_vm4, %v1863_v23, 0.0 }
 0xd69   :  { %1868 = vadd.xlane.f32.xlu1 %v1867_v26  ;;  %v3530_v27 = vpop.f32.mrf.mxu1 }
 0xd6a   :  { %v1864_v28 = vadd.f32 %v1860_v25, %v3993_v54  ;;  %v3696_v54 = vld [vmem:[%s4419_s4 + $0x40] ss:$24 sps:$4 sm:$0xff]   ;;  %v3220_v27 = vld [vmem:[%s4422_s7 + $0xb] ss:$0 sm:$0xff] }
 0xd6b   :  { %3532 = vmatpush3.bf16.msra.mxu1 %v3696_v54 }
 0xd6c   :  { %v1870_v29 = vsel %vm185_vm4, %v1864_v28, 0.0  ;;  %3533 = vmatprep.subr.bf16.mxu1 %v3860_v1 }
 0xd6d   :  { %1871 = vadd.xlane.f32.xlu0 %v1870_v29 }
 0xd6f   :  { %3534 = vmatpush3.bf16.msra.mxu1 %v3697_v12 }
 0xd70   :  { %3551 = vmatprep.subr.bf16.mxu1 %v3860_v1 }
 0xdf2   :  { %v1869_v30 = vpop.xlane.xlu1 %1868 }
 0xdf3   :  { %v1873_v31 = vmul.f32 0.03125, %v1869_v30 }
 0xdf5   :  { %v1875_v32 = vsub.f32 %v1863_v23, %v1873_v31 }
 0xdf6   :  { %v1872_v34 = vpop.xlane.xlu0 %1871 }
 0xdf7   :  { %v1874_v35 = vmul.f32 0.03125, %v1872_v34  ;;  %v1877_v36 = vmul.f32 %v1875_v32, %v1875_v32 }
 0xdf9   :  { %v1876_v38 = vsub.f32 %v1864_v28, %v1874_v35  ;;  %v1879_v53 = vsel %vm185_vm4, %v1877_v36, 0.0 }
 0xdfa   :  { %1880 = vadd.xlane.f32.xlu0 %v1879_v53 }
 0xdfb   :  { %v1878_v33 = vmul.f32 %v1876_v38, %v1876_v38 }
 0xdfd   :  { %v1882_v39 = vsel %vm185_vm4, %v1878_v33, 0.0 }
 0xdfe   :  { %1883 = vadd.xlane.f32.xlu1 %v1882_v39 }
 0xe83   :  { %v1881_v40 = vpop.xlane.xlu0 %1880 }
 0xe84   :  { %v1885_v41 = vmul.f32 0.03125, %v1881_v40 }
 0xe86   :  { %v1887_v37 = vadd.f32 1e-05, %v1885_v41 }
 0xe87   :  { %v1884_v42 = vpop.xlane.xlu1 %1883 }
 0xe88   :  { %3774 = vrsqrt.f32 %v1887_v37  ;;  %v1886_v43 = vmul.f32 0.03125, %v1884_v42 }
 0xe8a   :  { %v1888_v15 = vadd.f32 1e-05, %v1886_v43 }
 0xe8c   :  { %3776 = vrsqrt.f32 %v1888_v15 }
 0xe95   :  { %v3775_v44 = vpop.eup %3774 }
 0xe96   :  { %v1891_v45 = vmul.f32 %v3775_v44, %v1875_v32  ;;  %v3702_v44 = vld [vmem:[%s4419_s4 + $0x44] ss:$24 sps:$4 sm:$0xff]  }
 0xe98   :  { %v1897_v49 = vmul.f32 %v3214_v46, %v1891_v45  ;;  %v3703_v45 = vld [vmem:[%s4419_s4 + $0x14] ss:$24 sps:$4 sm:$0xff]  }
 0xe99   :  { %v3777_v47 = vpop.eup %3776 }
 0xe9a   :  { %v1892_v48 = vmul.f32 %v3777_v47, %v1876_v38  ;;  %v1903_v52 = vadd.f32 %v3215_v50, %v1897_v49  ;;  %v4276_v47 = vld [vmem:[#allocation2 + $0x40] sm:$0xff] }
 0xe9c   :  { %v1898_v51 = vmul.f32 %v3214_v46, %v1892_v48  ;;  %v4274_v46 = vld [vmem:[#allocation2] sm:$0xff]  ;;  %v2192_v48 = vld [vmem:[#allocation2 + $0x8] sm:$0xff] }
 0xe9d   :  { %v3232_v49 = vcombine.low %v4274_v46, %v4276_v47 }
 0xe9e   :  { %v1904_v55 = vadd.f32 %v3215_v50, %v1898_v51  ;;  %v3233_v50 = vcombine.high %v4274_v46, %v4276_v47  ;;  %v2200_v51 = vld [vmem:[#allocation2 + $0x48] sm:$0xff]  ;;  %v3705_v47 = vld [vmem:[#allocation5 + $0x30] sm:$0xff]  }
 0xea0   :  { %v1905_v18 = vpack.c.bf16 %v1904_v55, %v1903_v52 }
 0xea2   :  { %3536 = vmatmul.mubr.msk.bf16.vlgmr.msra.gmra.mxu1 %vm185_vm4, %v1905_v18  ;;  %v3235_v18 = vcombine.high %v2192_v48, %v2200_v51 }
 0xea3   :  { %3555 = vmatprep.mubr.msk.bf16.mxu1 %vm3861_vm0, %v3860_v1  ;;  %3552 = vmatpush3.bf16.msra.mxu1 %v3702_v44 }
 0xea4   :  { %3553 = vmatprep.subr.bf16.mxu1 %v3860_v1  ;;  %2345 = vmatprep.subr.bf16.mxu0 %v3235_v18 }
 0xea7   :  { %3554 = vmatpush3.bf16.msra.mxu1 %v3703_v45  ;;  %v3704_v45 = vld [vmem:[#allocation5 + $0x38] sm:$0xff]  }
 0xea8   :  { %2304 = vmatprep.subr.bf16.mxu1 %v3233_v50  ;;  %v3706_v50 = vld [vmem:[#allocation5 + $0x28] sm:$0xff]  }
 0xf62   :  { %v1964_v61 = vpop.f32.mrf.mxu1 }
 0xf63   :  { %v1965_v62 = vadd.f32 %v3216_v60, %v1964_v61  ;;  %v2196_v61 = vld [vmem:[#allocation2 + $0x28] sm:$0xff] }
 0xf64   :  { %v3537_v63 = vpop.f32.mrf.mxu1 }
 0xf65   :  { %v1971_v2 = vmul.f32 %v1965_v62, %v1965_v62 }
 0xf66   :  { %v1967_v4 = vpop.f32.mrf.mxu1 }
 0xf67   :  { %v1973_v8 = vmul.f32 %v1971_v2, %v1965_v62  ;;  %v1968_v10 = vadd.f32 %v3216_v60, %v1967_v4  ;;  %v3239_v60 = vcombine.high %v2194_v57, %v2202_v58  ;;  %v2198_v4 = vld [vmem:[#allocation2 + $0x38] sm:$0xff] }
 0xf68   :  { %v3538_v5 = vpop.f32.mrf.mxu1  ;;  %v3708_v57 = vld [vmem:[#allocation5 + $0x18] sm:$0xff]  }
 0xf69   :  { %v1975_v9 = vmul.f32 0.044715, %v1973_v8  ;;  %v1972_v11 = vmul.f32 %v1968_v10, %v1968_v10  ;;  %v2206_v8 = vld [vmem:[#allocation2 + $0x78] sm:$0xff] }
 0xf6a   :  { %v3247_v5 = vcombine.high %v2198_v4, %v2206_v8 }
 0xf6b   :  { %v1977_v13 = vadd.f32 %v1975_v9, %v1965_v62  ;;  %v1974_v14 = vmul.f32 %v1972_v11, %v1968_v10 }
 0xf6d   :  { %v1979_v16 = vmul.f32 0.7978846, %v1977_v13  ;;  %v1976_v17 = vmul.f32 0.044715, %v1974_v14 }
 0xf6f   :  { %3778 = vtanh.f32 %v1979_v16  ;;  %v1978_v19 = vadd.f32 %v1976_v17, %v1968_v10 }
 0xf71   :  { %v1980_v20 = vmul.f32 0.7978846, %v1978_v19 }
 0xf73   :  { %3780 = vtanh.f32 %v1980_v20  ;;  %v3226_v20 = vld [vmem:[%s4422_s7 + $0x4] ss:$0 sm:$0xff] }
 0xf7c   :  { %v3779_v21 = vpop.eup %3778 }
 0xf7d   :  { %v1983_v6 = vadd.f32 1.0, %v3779_v21 }
 0xf7f   :  { %v1985_v3 = vmul.f32 0.5, %v1983_v6 }
 0xf80   :  { %v3781_v22 = vpop.eup %3780 }
 0xf81   :  { %v1984_v7 = vadd.f32 1.0, %v3781_v22  ;;  %v1987_v24 = vmul.f32 %v1985_v3, %v1965_v62  ;;  %v2204_v62 = vld [vmem:[#allocation2 + $0x68] sm:$0xff]  ;;  %v3227_v3 = vld [vmem:[%s4422_s7 + $0x5] ss:$0 sm:$0xff] }
 0xf82   :  { %v3242_v63 = vcombine.low %v2196_v61, %v2204_v62  ;;  %v3243_v2 = vcombine.high %v2196_v61, %v2204_v62 }
 0xf83   :  { %v1986_v23 = vmul.f32 0.5, %v1984_v7 }
 0xf85   :  { %v1988_v25 = vmul.f32 %v1986_v23, %v1968_v10  ;;  %v3246_v10 = vcombine.low %v2198_v4, %v2206_v8  ;;  %v3712_v4 = vld [vmem:[#allocation5 + $0x78] sm:$0xff]   ;;  %v3713_v8 = vld [vmem:[#allocation5 + $0x70] sm:$0xff]  }
 0xf87   :  { %v1989_v26 = vpack.c.bf16 %v1988_v25, %v1987_v24 }
 0xf89   :  { %3548 = vmatmul.mubr.msk.bf16.vlgmr.msra.gmra.mxu0 %vm2027_vm8, %v1989_v26 }
 0xf8a   :  { %2363 = vmatprep.mubr.bf16.mxu0 %v3859_v0 }
0x1049   :  { %v2065_v28 = vpop.f32.mrf.mxu0 }
0x104a   :  { %v2066_v29 = vadd.f32 %v3220_v27, %v2065_v28 }
0x104b   :  { %v3549_v30 = vpop.f32.mrf.mxu0 }
0x104c   :  { %v2072_v31 = vadd.f32 %v2066_v29, %v1903_v52  ;;  %v2189_v52 = vld [vmem:[%s4417_s2] sm:$0x3] }
0x104d   :  { %v2068_v32 = vpop.f32.mrf.mxu0  ;;  %v4285_v56 = vpack.c.bf16 %v2189_v52, %v2189_v52 }
0x104e   :  { %v2069_v34 = vadd.f32 %v3220_v27, %v2068_v32  ;;  %v2076_v35 = vsel %vm185_vm4, %v2072_v31, 0.0  ;;  %v2201_v32 = vld [vmem:[#allocation2 + $0x50] sm:$0xff] }
0x104f   :  { %2077 = vadd.xlane.f32.xlu1 %v2076_v35  ;;  %v3550_v36 = vpop.f32.mrf.mxu0 }
0x1050   :  { %v2073_v38 = vadd.f32 %v2069_v34, %v1904_v55  ;;  %v3234_v55 = vcombine.low %v2192_v48, %v2200_v51 }
0x1052   :  { %v2079_v53 = vsel %vm185_vm4, %v2073_v38, 0.0  ;;  %2346 = vmatpush1.bf16.msra.mxu0 %v3234_v55  ;;  %v3707_v55 = vld [vmem:[#allocation5 + $0x20] sm:$0xff]  }
0x1053   :  { %2080 = vadd.xlane.f32.xlu0 %v2079_v53  ;;  %2427 = vmatprep.subr.bf16.mxu0 %v3239_v60  ;;  %v2203_v53 = vld [vmem:[#allocation2 + $0x60] sm:$0xff]  ;;  %v3709_v60 = vld [vmem:[#allocation5 + $0x10] sm:$0xff]  }
0x1055   :  { %3249 = vmatmul.mubr.msk.bf16.vlgmr.msra.gmra.mxu0 %vm1791_vm6, %v4285_v56 }
0x1056   :  { %2445 = vmatprep.mubr.bf16.mxu0 %v3859_v0  ;;  %2428 = vmatpush1.bf16.msra.mxu0 %v3238_v59 }
0x1057   :  { %2509 = vmatprep.subr.bf16.mxu0 %v3243_v2  ;;  %v3711_v2 = vld [vmem:[#allocation5] sm:$0xff]  }
0x105d   :  { %3251 = vmatmul.mubr.msk.bf16.vlgmr.msra.gmra.mxu0 %vm1791_vm6, %v4285_v56 }
0x105e   :  { %2527 = vmatprep.mubr.bf16.mxu0 %v3859_v0  ;;  %2510 = vmatpush1.bf16.msra.mxu0 %v3242_v63  ;;  %v3710_v63 = vld [vmem:[#allocation5 + $0x8] sm:$0xff]  }
0x105f   :  { %2591 = vmatprep.subr.bf16.mxu0 %v3247_v5  ;;  %v3715_v5 = vld [vmem:[#allocation5 + $0x60] sm:$0xff]  }
0x1065   :  { %3253 = vmatmul.mubr.msk.bf16.vlgmr.msra.gmra.mxu0 %vm1791_vm6, %v4285_v56 }
0x1066   :  { %2609 = vmatprep.mubr.bf16.mxu0 %v3859_v0  ;;  %2592 = vmatpush1.bf16.msra.mxu0 %v3246_v10  ;;  %v3714_v10 = vld [vmem:[#allocation5 + $0x68] sm:$0xff]  }
0x1067   :  { %3579 = vmatprep.subr.bf16.mxu0 %v3860_v1 }
0x106d   :  { %3255 = vmatmul.mubr.msk.bf16.vlgmr.msra.gmra.mxu0 %vm1791_vm6, %v4285_v56 }
0x106e   :  { %3595 = vmatprep.mubr.msk.bf16.mxu0 %vm3861_vm0, %v3860_v1  ;;  %3580 = vmatpush3.bf16.msra.mxu0 %v3712_v4 }
0x106f   :  { %3581 = vmatprep.subr.bf16.mxu0 %v3860_v1 }
0x1072   :  { %3582 = vmatpush3.bf16.msra.mxu0 %v3713_v8  ;;  %v3721_v8 = vld [vmem:[#allocation5 + $0x80] sm:$0xff]  }
0x1073   :  { %3583 = vmatprep.subr.bf16.mxu0 %v3860_v1 }
0x1076   :  { %3584 = vmatpush3.bf16.msra.mxu0 %v3714_v10 }
0x1077   :  { %3585 = vmatprep.subr.bf16.mxu0 %v3860_v1 }
0x107a   :  { %3586 = vmatpush3.bf16.msra.mxu0 %v3715_v5 }
0x107b   :  { %3587 = vmatprep.subr.bf16.mxu0 %v3860_v1 }
0x10d8   :  { %v2078_v33 = vpop.xlane.xlu1 %2077 }
0x10d9   :  { %v2082_v39 = vmul.f32 0.03125, %v2078_v33 }
0x10db   :  { %v4257_v54 = vsub.f32 %v2072_v31, %v2082_v39  ;;  %v2193_v31 = vld [vmem:[#allocation2 + $0x10] sm:$0xff] }
0x10dc   :  { %v2081_v12 = vpop.xlane.xlu0 %2080  ;;  %v3237_v36 = vcombine.high %v2193_v31, %v2201_v32  ;;  %v3236_v33 = vcombine.low %v2193_v31, %v2201_v32 }
0x10dd   :  { %v2083_v40 = vmul.f32 0.03125, %v2081_v12  ;;  %v2086_v41 = vmul.f32 %v4257_v54, %v4257_v54  ;;  %v2205_v12 = vld [vmem:[#allocation2 + $0x70] sm:$0xff] }
0x10df   :  { %v4261_v37 = vsub.f32 %v2073_v38, %v2083_v40  ;;  %v2088_v42 = vsel %vm185_vm4, %v2086_v41, 0.0  ;;  %v2195_v38 = vld [vmem:[#allocation2 + $0x20] sm:$0xff] }
0x10e0   :  { %2089 = vadd.xlane.f32.xlu1 %v2088_v42  ;;  %v3241_v39 = vcombine.high %v2195_v38, %v2203_v53  ;;  %v3240_v40 = vcombine.low %v2195_v38, %v2203_v53 }
0x10e1   :  { %v2087_v43 = vmul.f32 %v4261_v37, %v4261_v37 }
0x10e3   :  { %v2091_v15 = vsel %vm185_vm4, %v2087_v43, 0.0 }
0x10e4   :  { %2092 = vadd.xlane.f32.xlu0 %v2091_v15 }
0x1115   :  { %v4328_v42 = vpop.f32.mrf.mxu0 }
0x1117   :  { %v4330_v43 = vpop.f32.mrf.mxu0 }
0x1119   :  { %v2369_v15 = vpop.f32.mrf.mxu0 }
0x111b   :  { %v2370_v44 = vpop.f32.mrf.mxu0 }
0x111d   :  { %v4332_v46 = vpop.f32.mrf.mxu0 }
0x1169   :  { %v2090_v9 = vpop.xlane.xlu1 %2089 }
0x116a   :  { %v2094_v11 = vmul.f32 0.03125, %v2090_v9  ;;  %v3716_v9 = vld [vmem:[#allocation5 + $0x58] sm:$0xff]  }
0x116b   :  { %3588 = vmatpush3.bf16.msra.mxu0 %v3716_v9  ;;  %v3728_v9 = vld [vmem:[#allocation5 + $0x98] sm:$0xff]  }
0x116c   :  { %v2096_v13 = vadd.f32 1e-05, %v2094_v11  ;;  %v3717_v11 = vld [vmem:[#allocation5 + $0x50] sm:$0xff]   ;;  %3589 = vmatprep.subr.bf16.mxu0 %v3860_v1 }
0x116d   :  { %v2093_v14 = vpop.xlane.xlu0 %2092 }
0x116e   :  { %3782 = vrsqrt.f32 %v2096_v13  ;;  %v2095_v16 = vmul.f32 0.03125, %v2093_v14 }
0x116f   :  { %3590 = vmatpush3.bf16.msra.mxu0 %v3717_v11  ;;  %v3729_v11 = vld [vmem:[#allocation5 + $0x90] sm:$0xff]  }
0x1170   :  { %v2097_v17 = vadd.f32 1e-05, %v2095_v16  ;;  %3591 = vmatprep.subr.bf16.mxu0 %v3860_v1 }
0x1172   :  { %3784 = vrsqrt.f32 %v2097_v17 }
0x117b   :  { %v3783_v19 = vpop.eup %3782 }
0x117c   :  { %v2100_v21 = vmul.f32 %v3783_v19, %v4257_v54  ;;  %v2197_v54 = vld [vmem:[#allocation2 + $0x30] sm:$0xff] }
0x117d   :  { %v3245_v41 = vcombine.high %v2197_v54, %v2205_v12 }
0x117e   :  { %v2106_v6 = vmul.f32 %v3226_v20, %v2100_v21 }
0x117f   :  { %v3785_v22 = vpop.eup %3784 }
0x1180   :  { %v2101_v7 = vmul.f32 %v3785_v22, %v4261_v37  ;;  %v2112_v24 = vadd.f32 %v3227_v3, %v2106_v6  ;;  %v3244_v37 = vcombine.low %v2197_v54, %v2205_v12 }
0x1182   :  { %v2107_v23 = vmul.f32 %v3226_v20, %v2101_v7  ;;  %v2114_v26 = vpack.c.bf16 %v2112_v24, %v2112_v24 }
0x1184   :  { %v2113_v25 = vadd.f32 %v3227_v3, %v2107_v23  ;;  %v2127_v29 = vunpack.c.l.b16 %v2114_v26 }
0x1186   :  { %v2115_v27 = vpack.c.bf16 %v2113_v25, %v2113_v25 }
0x1188   :  { %v2128_v28 = vunpack.c.l.b16 %v2115_v27 }
0x118a   :  { %v2129_v30 = vrot.slane %v2128_v28, 7 }
0x118c   :  { %v2131_v34 = vsel %vm2130_vm9, %v2129_v30, %v2127_v29 }
0x118d   :  { %v2132_v35 = vpack.c.b16 %v2131_v34, %v2131_v34 }
0x118f   :  { %3556 = vmatmul.mubr.msk.bf16.vlgmr.msra.gmra.mxu1 %vm185_vm4, %v2132_v35 }
0x1190   :  { %2305 = vmatpush1.bf16.msra.mxu1 %v3232_v49  ;;  %2322 = vmatprep.mubr.bf16.mxu1 %v3859_v0 }
0x1191   :  { %2386 = vmatprep.subr.bf16.mxu1 %v3237_v36 }
0x1197   :  { %3248 = vmatmul.mubr.msk.bf16.vlgmr.msra.gmra.mxu1 %vm1791_vm6, %v4285_v56 }
0x1198   :  { %2387 = vmatpush1.bf16.msra.mxu1 %v3236_v33  ;;  %2404 = vmatprep.mubr.bf16.mxu1 %v3859_v0 }
0x1199   :  { %2468 = vmatprep.subr.bf16.mxu1 %v3241_v39 }
0x119f   :  { %3250 = vmatmul.mubr.msk.bf16.vlgmr.msra.gmra.mxu1 %vm1791_vm6, %v4285_v56 }
0x11a0   :  { %2469 = vmatpush1.bf16.msra.mxu1 %v3240_v40  ;;  %2486 = vmatprep.mubr.bf16.mxu1 %v3859_v0 }
0x11a1   :  { %2550 = vmatprep.subr.bf16.mxu1 %v3245_v41 }
0x11a7   :  { %3252 = vmatmul.mubr.msk.bf16.vlgmr.msra.gmra.mxu1 %vm1791_vm6, %v4285_v56 }
0x11a8   :  { %2551 = vmatpush1.bf16.msra.mxu1 %v3244_v37  ;;  %2568 = vmatprep.mubr.bf16.mxu1 %v3859_v0  ;;  %v4335_v0 = vpop.f32.mrf.mxu0 }
0x11a9   :  { %3559 = vmatprep.subr.bf16.mxu1 %v3860_v1 }
0x11aa   :  { %v2451_v48 = vpop.f32.mrf.mxu0 }
0x11ab   :  { %v3722_v48 = vld [vmem:[#allocation5 + $0xc8] sm:$0xff]  }
0x11ac   :  { %v2452_v49 = vpop.f32.mrf.mxu0 }
0x11ad   :  { %v3723_v49 = vld [vmem:[#allocation5 + $0xc0] sm:$0xff]  }
0x11ae   :  { %v4338_v51 = vpop.f32.mrf.mxu0 }
0x11af   :  { %3254 = vmatmul.mubr.msk.bf16.vlgmr.msra.gmra.mxu1 %vm1791_vm6, %v4285_v56 }
0x11b0   :  { %3575 = vmatprep.mubr.msk.bf16.mxu1 %vm3861_vm0, %v3860_v1  ;;  %3560 = vmatpush3.bf16.msra.mxu1 %v3704_v45  ;;  %v4341_v52 = vpop.f32.mrf.mxu0 }
0x11b1   :  { %3561 = vmatprep.subr.bf16.mxu1 %v3860_v1 }
0x11b2   :  { %v2533_v18 = vpop.f32.mrf.mxu0 }
0x11b3   :  { %v3228_v18 = vld [vmem:[%s4422_s7 + $0xc] ss:$0 sm:$0xff] }
0x11b4   :  { %3562 = vmatpush3.bf16.msra.mxu1 %v3705_v47  ;;  %v2534_v56 = vpop.f32.mrf.mxu0  ;;  %v3719_v47 = vld [vmem:[#allocation5 + $0x40] sm:$0xff]  }
0x11b5   :  { %3563 = vmatprep.subr.bf16.mxu1 %v3860_v1 }
0x11b6   :  { %v4344_v58 = vpop.f32.mrf.mxu0 }
0x11b8   :  { %3564 = vmatpush3.bf16.msra.mxu1 %v3706_v50  ;;  %v4347_v59 = vpop.f32.mrf.mxu0  ;;  %v3724_v50 = vld [vmem:[#allocation5 + $0xb8] sm:$0xff]  }
0x11b9   :  { %3565 = vmatprep.subr.bf16.mxu1 %v3860_v1 }
0x11ba   :  { %v2615_v61 = vpop.f32.mrf.mxu0 }
0x11bc   :  { %3566 = vmatpush3.bf16.msra.mxu1 %v3707_v55  ;;  %v2616_v62 = vpop.f32.mrf.mxu0  ;;  %v3727_v55 = vld [vmem:[#allocation5 + $0xa0] sm:$0xff]  }
0x11bd   :  { %3567 = vmatprep.subr.bf16.mxu1 %v3860_v1 }
0x11c0   :  { %3568 = vmatpush3.bf16.msra.mxu1 %v3708_v57  ;;  %v3257_v57 = vld [vmem:[%s4422_s7 + $0xe] ss:$0 sm:$0xff] }
0x11c1   :  { %3569 = vmatprep.subr.bf16.mxu1 %v3860_v1 }
0x11c4   :  { %3570 = vmatpush3.bf16.msra.mxu1 %v3709_v60 }
0x11c5   :  { %3571 = vmatprep.subr.bf16.mxu1 %v3860_v1 }
0x11c8   :  { %3572 = vmatpush3.bf16.msra.mxu1 %v3710_v63  ;;  %v3720_v63 = vld [vmem:[#allocation5 + $0x88] sm:$0xff]  }
0x11c9   :  { %3573 = vmatprep.subr.bf16.mxu1 %v3860_v1 }
0x11cc   :  { %3574 = vmatpush3.bf16.msra.mxu1 %v3711_v2 }
0x11cd   :  { %3599 = vmatprep.subr.bf16.mxu1 %v3860_v1 }
0x124f   :  { %v4358_v13 = vpop.f32.mrf.mxu1 }
0x1250   :  { %v2183_v56 = vadd.f32 %v3228_v18, %v4358_v13  ;;  %v3730_v13 = vld [vmem:[#allocation5 + $0x108] sm:$0xff]  }
0x1251   :  { %v3557_v14 = vpop.f32.mrf.mxu1 }
0x1252   :  { %3786 = vtanh.f32 %v2183_v56  ;;  %v3731_v14 = vld [vmem:[#allocation5 + $0x100] sm:$0xff]  }
0x1253   :  { %v2185_v16 = vpop.f32.mrf.mxu1 }
0x1254   :  { %v3732_v16 = vld [vmem:[#allocation5 + $0xf8] sm:$0xff]  }
0x1255   :  { %v3558_v17 = vpop.f32.mrf.mxu1 }
0x1256   :  { %v3733_v17 = vld [vmem:[#allocation5 + $0xf0] sm:$0xff]  }
0x1257   :  { %v2324_v19 = vpop.f32.mrf.mxu1 }
0x1259   :  { %v2326_v20 = vpop.f32.mrf.mxu1 }
0x125a   :  { %v2618_v21 = vmax.f32 %v2324_v19, %v2326_v20  ;;  %v3734_v19 = vld [vmem:[#allocation5 + $0xe8] sm:$0xff]   ;;  %v3735_v20 = vld [vmem:[#allocation5 + $0xe0] sm:$0xff]  }
0x125b   :  { %v2328_v6 = vpop.f32.mrf.mxu1 }
0x125c   :  { %v2619_v22 = vmax.f32 %v2618_v21, %v4328_v42  ;;  %v3256_v42 = vld [vmem:[%s4422_s7 + $0xd] ss:$0 sm:$0xff]  ;;  %v3266_v21 = vld [vmem:[%s4422_s7 + $0xf] ss:$0 sm:$0xff] }
0x125d   :  { %v2329_v3 = vpop.f32.mrf.mxu1 }
0x125e   :  { %v2620_v7 = vmax.f32 %v2619_v22, %v4330_v43 }
0x125f   :  { %v2406_v23 = vpop.f32.mrf.mxu1  ;;  %v3787_v10 = vpop.eup %3786 }
0x1260   :  { %v2621_v24 = vmax.f32 %v2620_v7, %v2406_v23  ;;  %v2862_v5 = vpack.c.bf16 %v3787_v10, %v3787_v10 }
0x1261   :  { %v2408_v25 = vpop.f32.mrf.mxu1 }
0x1262   :  { %v2622_v26 = vmax.f32 %v2621_v24, %v2408_v25 }
0x1263   :  { %v2410_v27 = vpop.f32.mrf.mxu1 }
0x1264   :  { %v2623_v28 = vmax.f32 %v2622_v26, %v4332_v46 }
0x1265   :  { %v2411_v29 = vpop.f32.mrf.mxu1 }
0x1266   :  { %v2624_v30 = vmax.f32 %v2623_v28, %v4335_v0  ;;  %v3718_v0 = vld [vmem:[#allocation5 + $0x48] sm:$0xff]  }
0x1267   :  { %v2488_v31 = vpop.f32.mrf.mxu1  ;;  %3592 = vmatpush3.bf16.msra.mxu0 %v3718_v0 }
0x1268   :  { %v2625_v32 = vmax.f32 %v2624_v30, %v2488_v31  ;;  %3593 = vmatprep.subr.bf16.mxu0 %v3860_v1  ;;  %v3736_v30 = vld [vmem:[#allocation5 + $0xd8] sm:$0xff]   ;;  %v3737_v31 = vld [vmem:[#allocation5 + $0xd0] sm:$0xff]  }
0x1269   :  { %v2490_v34 = vpop.f32.mrf.mxu1 }
0x126a   :  { %v2626_v35 = vmax.f32 %v2625_v32, %v2490_v34  ;;  %v3286_v34 = vld [vmem:[%s4422_s7 + $0x10] ss:$0 sm:$0xff] }
0x126b   :  { %v2492_v36 = vpop.f32.mrf.mxu1  ;;  %3594 = vmatpush3.bf16.msra.mxu0 %v3719_v47 }
0x126c   :  { %v2627_v38 = vmax.f32 %v2626_v35, %v4338_v51  ;;  %3619 = vmatprep.subr.bf16.mxu0 %v3860_v1  ;;  %v3725_v51 = vld [vmem:[#allocation5 + $0xb0] sm:$0xff]  }
0x126d   :  { %v2493_v53 = vpop.f32.mrf.mxu1 }
0x126e   :  { %v2628_v33 = vmax.f32 %v2627_v38, %v4341_v52  ;;  %v3726_v52 = vld [vmem:[#allocation5 + $0xa8] sm:$0xff]  }
0x126f   :  { %v2570_v39 = vpop.f32.mrf.mxu1 }
0x1270   :  { %v2629_v54 = vmax.f32 %v2628_v33, %v2570_v39 }
0x1271   :  { %v2572_v12 = vpop.f32.mrf.mxu1 }
0x1272   :  { %v2630_v40 = vmax.f32 %v2629_v54, %v2572_v12  ;;  %v3287_v12 = vld [vmem:[%s4422_s7 + $0x11] ss:$0 sm:$0xff] }
0x1273   :  { %v2574_v41 = vpop.f32.mrf.mxu1 }
0x1274   :  { %v2631_v37 = vmax.f32 %v2630_v40, %v4344_v58 }
0x1275   :  { %v2575_v43 = vpop.f32.mrf.mxu1 }
0x1276   :  { %v2632_v15 = vmax.f32 %v2631_v37, %v4347_v59 }
0x1278   :  { %v2638_v44 = vadd.f32 %v3256_v42, %v2632_v15 }
0x127a   :  { %v2639_v45 = vmax.f32 %v2638_v44, 0.0 }
0x127c   :  { %v2640_v46 = vpack.c.bf16 %v2639_v45, %v2639_v45 }
0x127e   :  { %3576 = vmatmul.mubr.bf16.vlgmr.msra.gmra.mxu1 %v2640_v46 }
0x127f   :  { %3615 = vmatprep.mubr.msk.bf16.mxu1 %vm3861_vm0, %v3860_v1  ;;  %3600 = vmatpush3.bf16.msra.mxu1 %v3722_v48 }
0x1280   :  { %3601 = vmatprep.subr.bf16.mxu1 %v3860_v1 }
0x1283   :  { %3602 = vmatpush3.bf16.msra.mxu1 %v3723_v49 }
0x1284   :  { %3603 = vmatprep.subr.bf16.mxu1 %v3860_v1 }
0x1287   :  { %3604 = vmatpush3.bf16.msra.mxu1 %v3724_v50 }
0x1288   :  { %3605 = vmatprep.subr.bf16.mxu1 %v3860_v1 }
0x128b   :  { %3606 = vmatpush3.bf16.msra.mxu1 %v3725_v51 }
0x128c   :  { %3607 = vmatprep.subr.bf16.mxu1 %v3860_v1 }
0x128f   :  { %3608 = vmatpush3.bf16.msra.mxu1 %v3726_v52 }
0x1290   :  { %3609 = vmatprep.subr.bf16.mxu1 %v3860_v1 }
0x1293   :  { %3610 = vmatpush3.bf16.msra.mxu1 %v3727_v55 }
0x1294   :  { %3611 = vmatprep.subr.bf16.mxu1 %v3860_v1 }
0x1297   :  { %3612 = vmatpush3.bf16.msra.mxu1 %v3728_v9 }
0x1298   :  { %3613 = vmatprep.subr.bf16.mxu1 %v3860_v1 }
0x129b   :  { %3614 = vmatpush3.bf16.msra.mxu1 %v3729_v11 }
0x133e   :  { %v2744_v58 = vpop.f32.mrf.mxu1 }
0x133f   :  { %v2745_v59 = vadd.f32 %v3257_v57, %v2744_v58 }
0x1340   :  { %v3577_v60 = vpop.f32.mrf.mxu1 }
0x1341   :  { %v2750_v61 = vmax.f32 %v2745_v59, 0.0 }
0x1342   :  { %v2747_v62 = vpop.f32.mrf.mxu1 }
0x1343   :  { %v2751_v2 = vpack.c.bf16 %v2750_v61, %v2750_v61 }
0x1344   :  { %v3578_v4 = vpop.f32.mrf.mxu1 }
0x1345   :  { %3596 = vmatmul.mubr.bf16.vlgmr.msra.gmra.mxu0 %v2751_v2 }
0x1346   :  { %3620 = vmatpush3.bf16.msra.mxu0 %v3720_v63  ;;  %3623 = vmatprep.mubr.msk.bf16.mxu0 %vm3861_vm0, %v3860_v1 }
0x1347   :  { %3621 = vmatprep.subr.bf16.mxu0 %v3860_v1 }
0x134a   :  { %3622 = vmatpush3.bf16.msra.mxu0 %v3721_v8 }
0x134b   :  { %3627 = vmatprep.subr.bf16.mxu0 %v3860_v1 }
0x134d   :  { %3624 = vmatmul.mubr.msk.bf16.vlgmr.msra.gmra.mxu0 %vm185_vm4, %v2862_v5 }
0x134e   :  { %3643 = vmatprep.mubr.msk.bf16.mxu0 %vm3861_vm0, %v3860_v1  ;;  %3628 = vmatpush3.bf16.msra.mxu0 %v3730_v13 }
0x134f   :  { %3629 = vmatprep.subr.bf16.mxu0 %v3860_v1 }
0x1352   :  { %3630 = vmatpush3.bf16.msra.mxu0 %v3731_v14 }
0x1353   :  { %3631 = vmatprep.subr.bf16.mxu0 %v3860_v1 }
0x1356   :  { %3632 = vmatpush3.bf16.msra.mxu0 %v3732_v16 }
0x1357   :  { %3633 = vmatprep.subr.bf16.mxu0 %v3860_v1 }
0x135a   :  { %3634 = vmatpush3.bf16.msra.mxu0 %v3733_v17 }
0x135b   :  { %3635 = vmatprep.subr.bf16.mxu0 %v3860_v1 }
0x135e   :  { %3636 = vmatpush3.bf16.msra.mxu0 %v3734_v19 }
0x135f   :  { %3637 = vmatprep.subr.bf16.mxu0 %v3860_v1 }
0x1362   :  { %3638 = vmatpush3.bf16.msra.mxu0 %v3735_v20 }
0x1363   :  { %3639 = vmatprep.subr.bf16.mxu0 %v3860_v1 }
0x1366   :  { %3640 = vmatpush3.bf16.msra.mxu0 %v3736_v30 }
0x1367   :  { %3641 = vmatprep.subr.bf16.mxu0 %v3860_v1 }
0x136a   :  { %3642 = vmatpush3.bf16.msra.mxu0 %v3737_v31 }
0x1405   :  { %v2855_v6 = vpop.f32.mrf.mxu0 }
0x1406   :  { %v2856_v22 = vadd.f32 %v3266_v21, %v2855_v6 }
0x1407   :  { %v3597_v3 = vpop.f32.mrf.mxu0 }
0x1408   :  { %v2861_v7 = vmax.f32 %v2856_v22, 0.0 }
0x1409   :  { %v2858_v23 = vpop.f32.mrf.mxu0 }
0x140a   :  { %v2867_v24 = vpack.c.bf16 %v2861_v7, %v2861_v7 }
0x140b   :  { %v3598_v25 = vpop.f32.mrf.mxu0 }
0x140c   :  { %3616 = vmatmul.mubr.bf16.vlgmr.msra.gmra.mxu1 %v2867_v24 }
0x140d   :  { %v3021_v26 = vpop.f32.mrf.mxu0 }
0x140f   :  { %v3625_v27 = vpop.f32.mrf.mxu0 }
0x1411   :  { %v3024_v28 = vpop.f32.mrf.mxu0 }
0x1413   :  { %v3626_v29 = vpop.f32.mrf.mxu0 }
0x14cc   :  { %v2966_v32 = vpop.f32.mrf.mxu1 }
0x14cd   :  { %v3022_v35 = vadd.f32 %v3021_v26, %v2966_v32 }
0x14ce   :  { %v3617_v36 = vpop.f32.mrf.mxu1 }
0x14cf   :  { %v3032_v38 = vadd.f32 %v3286_v34, %v3022_v35 }
0x14d0   :  { %v2969_v53 = vpop.f32.mrf.mxu1 }
0x14d1   :  { %v3033_v33 = vmax.f32 %v3032_v38, 0.0 }
0x14d2   :  { %v3618_v39 = vpop.f32.mrf.mxu1 }
0x14d3   :  { %v3034_v54 = vpack.c.bf16 %v3033_v33, %v3033_v33 }
0x14d5   :  { %3644 = vmatmul.mubr.bf16.vlgmr.msra.gmra.mxu0 %v3034_v54 }
0x1595   :  { %v3138_v1 = vpop.f32.mrf.mxu0 }
0x1596   :  { %v3139_v40 = vadd.f32 %v3287_v12, %v3138_v1 }
0x1597   :  { %v3645_v41 = vpop.f32.mrf.mxu0 }
0x1598   :  { %3144 = vst [vmem:[#allocation7] sm:$0x3] %v3139_v40 }
0x1599   :  { %v3141_v37 = vpop.f32.mrf.mxu0 }
0x159a   :  { %3839 = shalt.err (!%p3836_p0)
}
0x159b   :  { %3154 = dma.vmem_to_hbm [thread:$0]  %s3152_s26, 32, %s4423_s8, [#allocation4]   ;;  %v3646_v42 = vpop.f32.mrf.mxu0 }
0x159c   :  { %3852 = dma.done.wait [#allocation4], 32  }
0x159d   :  { %3853 = vsyncadd [#allocation4], 4294967264 }
0x159e   :  { %3158 = vsyncpa [#allocation3], 1 }
0x159f   :  { %3159 = vsyncpa [#allocation6], 1 }
0x15a0   :  { %3160 = vsyncpa [#allocation4], 1 }

</bundles_post_ra>
